<compile_context>
chip_gen: v7x
topology: tpu7x:2x2x1
jax: 0.10.0
libtpu: 0.0.40
codegen_flags: <defaults>
</compile_context>

<pallas_src>
import functools
import string

import jax
import jax.numpy as jnp
from jax.experimental import pallas as pl
from jax.experimental.pallas import tpu as pltpu


def _gru_lm_kernel(
    x_ref,        # (B, T, E)   embedded tokens for this block of T steps
    h0_ref,       # (B, G)      initial hidden state
    w_i_ref,      # (E, 3G)     fused input->hidden weights [r | z | n]
    b_i_ref,      # (1, 3G)
    w_h_ref,      # (G, 3G)     fused hidden->hidden weights [r | z | n]
    b_h_ref,      # (1, 3G)
    w_out_ref,    # (G, V)      output projection
    b_out_ref,    # (1, V)
    logits_ref,   # (B, T, V)   logits for this block of steps
    h_out_ref,    # (B, G)      final hidden state
    h_carry,      # (B, G)      VMEM carry of hidden state across grid steps
    hs_buf,       # (B, T, G)   VMEM buffer of per-step hidden states
    *,
    true_seq_len: int,
    has_pad: bool,
):
    i = pl.program_id(0)
    B, T, E = x_ref.shape
    G = h_carry.shape[-1]

    @pl.when(i == 0)
    def _():
        h_carry[...] = h0_ref[...].astype(jnp.float32)

    # ---- hoisted input-gate projection: one big MXU op over all B*T rows ----
    x_all = x_ref[...].astype(jnp.float32).reshape(B * T, E)
    gi_all = (
        jnp.dot(x_all, w_i_ref[...], preferred_element_type=jnp.float32) + b_i_ref[...]
    ).reshape(B, T, 3 * G)

    w_h = w_h_ref[...]
    b_h = b_h_ref[...]

    # ---- sequential recurrence (statically unrolled): only h @ W_h is serial ----
    h = h_carry[...]
    for t in range(T):
        gi = gi_all[:, t, :]                                   # (B, 3G) static slice
        gh = jnp.dot(h, w_h, preferred_element_type=jnp.float32) + b_h
        r = jax.nn.sigmoid(gi[:, :G] + gh[:, :G])
        z = jax.nn.sigmoid(gi[:, G:2 * G] + gh[:, G:2 * G])
        n = jnp.tanh(gi[:, 2 * G:] + r * gh[:, 2 * G:])
        h_new = (1.0 - z) * n + z * h
        if has_pad:
            # Freeze the hidden state on padded tail steps so h_final is exact.
            keep = ((i * T + t) < true_seq_len).astype(jnp.float32)
            h_new = keep * h_new + (1.0 - keep) * h
        h = h_new
        hs_buf[:, pl.ds(t, 1), :] = h[:, None, :]

    h_carry[...] = h

    # ---- hoisted output projection: one (B*T, G) @ (G, V) MXU op ----
    logits = (
        jnp.dot(hs_buf[...].reshape(B * T, G), w_out_ref[...],
                preferred_element_type=jnp.float32)
        + b_out_ref[...]
    )
    logits_ref[...] = logits.reshape(B, T, logits.shape[-1]).astype(logits_ref.dtype)

    @pl.when(i == pl.num_programs(0) - 1)
    def _():
        h_out_ref[...] = h.astype(h_out_ref.dtype)


def rnnlm_forward(x_ids, params, h_last=None, *, block_steps=8):
    """Pallas implementation of RNNLM.forward.

    Args:
      x_ids: (B, S) int32 token ids.
      params: dict of parameters (see init_params).
      h_last: optional (B, G) float32 initial hidden state.

    Returns:
      (logits (B, S, V) float32, h_final (B, G) float32)
    """
    B, S = x_ids.shape
    E = params["emb"].shape[1]
    G = params["w_h"].shape[0]
    V = params["w_out"].shape[1]

    # Embedding gather is a data-dependent gather -> plain JAX glue. No transposes:
    # the kernel consumes (B, S, E) and emits (B, S, V) directly.
    embedded = params["emb"][x_ids].astype(jnp.float32)        # (B, S, E)

    T = min(block_steps, S)
    pad = (-S) % T
    S_pad = S + pad
    if pad:
        embedded = jnp.pad(embedded, ((0, 0), (0, pad), (0, 0)))
    num_blocks = S_pad // T

    if h_last is None:
        h_last = jnp.zeros((B, G), jnp.float32)
    h_last = h_last.astype(jnp.float32)

    kernel = functools.partial(_gru_lm_kernel, true_seq_len=S, has_pad=bool(pad))

    def inv(shape):  # grid-invariant full-array block
        return pl.BlockSpec(shape, lambda i, _s=shape: (0,) * len(_s))

    grid_spec = pltpu.PrefetchScalarGridSpec(
        num_scalar_prefetch=0,
        grid=(num_blocks,),
        in_specs=[
            pl.BlockSpec((B, T, E), lambda i: (0, i, 0)),      # embedded x block
            inv((B, G)),                                       # h0
            inv((E, 3 * G)), inv((1, 3 * G)),                  # w_i, b_i
            inv((G, 3 * G)), inv((1, 3 * G)),                  # w_h, b_h
            inv((G, V)), inv((1, V)),                          # w_out, b_out
        ],
        out_specs=[
            pl.BlockSpec((B, T, V), lambda i: (0, i, 0)),      # logits block
            inv((B, G)),                                       # final hidden state
        ],
        scratch_shapes=[
            pltpu.VMEM((B, G), jnp.float32),                   # h carry
            pltpu.VMEM((B, T, G), jnp.float32),                # per-step hidden states
        ],
    )

    logits_pad, h_final = pl.pallas_call(
        kernel,
        out_shape=(
            jax.ShapeDtypeStruct((B, S_pad, V), jnp.float32),
            jax.ShapeDtypeStruct((B, G), jnp.float32),
        ),
        grid_spec=grid_spec,
        compiler_params=pltpu.CompilerParams(
            # hidden state is carried across grid steps -> must stay sequential
            dimension_semantics=("arbitrary",),
        ),
    )(
        embedded, h_last,
        params["w_i"], params["b_i"],
        params["w_h"], params["b_h"],
        params["w_out"], params["b_out"],
    )

    logits = logits_pad[:, :S, :] if pad else logits_pad
    return logits, h_final


def init_params(key, vocab_size, emb_size=32, gru_size=32):
    """Deterministic parameter init mimicking the PyTorch module's shapes (fused layout)."""
    keys = jax.random.split(key, 8)
    k = 1.0 / jnp.sqrt(gru_size)

    emb = jax.random.normal(keys[0], (vocab_size, emb_size), jnp.float32)
    emb = emb.at[0].set(0.0)   # padding_idx=0

    def u(kk, shape):
        return jax.random.uniform(kk, shape, jnp.float32, -k, k)

    return {
        "emb": emb,
        # Fused GRU weights, gate order [r | z | n], stored transposed for x @ W.
        "w_i": u(keys[1], (emb_size, 3 * gru_size)),
        "w_h": u(keys[2], (gru_size, 3 * gru_size)),
        "b_i": u(keys[3], (1, 3 * gru_size)),
        "b_h": u(keys[4], (1, 3 * gru_size)),
        # Output Linear, stored transposed as (G, V).
        "w_out": u(keys[5], (gru_size, vocab_size)),
        "b_out": u(keys[6], (1, vocab_size)),
    }


def rnnlm_reference(x_ids, params, h_last=None):
    """Pure-JAX reference of the same forward pass (for verification)."""
    B, S = x_ids.shape
    G = params["w_h"].shape[0]
    embedded = params["emb"][x_ids]                 # (B, S, E)
    h = jnp.zeros((B, G), jnp.float32) if h_last is None else h_last.astype(jnp.float32)

    def step(h, x):
        gi = x @ params["w_i"] + params["b_i"]
        gh = h @ params["w_h"] + params["b_h"]
        r = jax.nn.sigmoid(gi[:, :G] + gh[:, :G])
        z = jax.nn.sigmoid(gi[:, G:2 * G] + gh[:, G:2 * G])
        n = jnp.tanh(gi[:, 2 * G:] + r * gh[:, 2 * G:])
        h_new = (1.0 - z) * n + z * h
        return h_new, h_new

    h_final, hs = jax.lax.scan(step, h, jnp.transpose(embedded, (1, 0, 2)))
    outs = jnp.transpose(hs, (1, 0, 2))             # (B, S, G)
    logits = outs @ params["w_out"] + params["b_out"]
    return logits, h_final


if __name__ == "__main__":
    vocab_size = len(string.ascii_lowercase) + 4   # pad + letters + specials = 30
    B, S, E, G = 2, 8, 32, 32

    key = jax.random.PRNGKey(0)
    pkey, xkey = jax.random.split(key)
    params = init_params(pkey, vocab_size, emb_size=E, gru_size=G)
    x = jax.random.randint(xkey, (B, S), 0, vocab_size, dtype=jnp.int32)

    logits, h = rnnlm_forward(x, params, h_last=None)
    jax.block_until_ready((logits, h))

    assert logits.shape == (B, S, vocab_size)
    assert h.shape == (B, G)

    ref_logits, ref_h = rnnlm_reference(x, params, h_last=None)
    assert jnp.allclose(logits, ref_logits, atol=2e-3, rtol=2e-3)
    assert jnp.allclose(h, ref_h, atol=2e-3, rtol=2e-3)

    print("KERNEL_OK")
</pallas_src>

<mosaic_0001>
module attributes {stable_mosaic.version = 11 : i64} {
  func.func @_gru_lm_kernel(%arg0: i32, %arg1: memref<2x8x32xf32, #tpu.memory_space<vmem>>, %arg2: memref<2x32xf32, #tpu.memory_space<vmem>>, %arg3: memref<32x96xf32, #tpu.memory_space<vmem>>, %arg4: memref<1x96xf32, #tpu.memory_space<vmem>>, %arg5: memref<32x96xf32, #tpu.memory_space<vmem>>, %arg6: memref<1x96xf32, #tpu.memory_space<vmem>>, %arg7: memref<32x30xf32, #tpu.memory_space<vmem>>, %arg8: memref<1x30xf32, #tpu.memory_space<vmem>>, %arg9: memref<2x8x30xf32, #tpu.memory_space<vmem>>, %arg10: memref<2x32xf32, #tpu.memory_space<vmem>>, %arg11: memref<2x32xf32, #tpu.memory_space<vmem>>, %arg12: memref<2x8x32xf32, #tpu.memory_space<vmem>>) attributes {dimension_semantics = [#tpu.dimension_semantics<arbitrary>], iteration_bounds = array<i64: 1>, scalar_prefetch = 0 : i64, scratch_operands = 2 : i64, tpu.core_type = #tpu.core_type<tc>, window_params = [{transform_indices = @transform_0, window_bounds = array<i64: 2, 8, 32>}, {pipeline_mode = #tpu.pipeline_mode<synchronous>, transform_indices = @transform_1, window_bounds = array<i64: 2, 32>}, {pipeline_mode = #tpu.pipeline_mode<synchronous>, transform_indices = @transform_2, window_bounds = array<i64: 32, 96>}, {pipeline_mode = #tpu.pipeline_mode<synchronous>, transform_indices = @transform_3, window_bounds = array<i64: 1, 96>}, {pipeline_mode = #tpu.pipeline_mode<synchronous>, transform_indices = @transform_4, window_bounds = array<i64: 32, 96>}, {pipeline_mode = #tpu.pipeline_mode<synchronous>, transform_indices = @transform_5, window_bounds = array<i64: 1, 96>}, {pipeline_mode = #tpu.pipeline_mode<synchronous>, transform_indices = @transform_6, window_bounds = array<i64: 32, 30>}, {pipeline_mode = #tpu.pipeline_mode<synchronous>, transform_indices = @transform_7, window_bounds = array<i64: 1, 30>}, {transform_indices = @transform_8, window_bounds = array<i64: 2, 8, 30>}, {pipeline_mode = #tpu.pipeline_mode<synchronous>, transform_indices = @transform_9, window_bounds = array<i64: 2, 32>}]} {
    %c0_i32 = arith.constant 0 : i32
    %0 = arith.cmpi eq, %arg0, %c0_i32 : i32
    %1 = arith.extui %0 : i1 to i32
    %c0_i32_0 = arith.constant 0 : i32
    %2 = arith.cmpi ne, %1, %c0_i32_0 : i32
    scf.if %2 {
      %c0_77 = arith.constant 0 : index
      %c0_78 = arith.constant 0 : index
      %291 = vector.load %arg2[%c0_77, %c0_78] : memref<2x32xf32, #tpu.memory_space<vmem>>, vector<2x32xf32>
      %c0_79 = arith.constant 0 : index
      %c0_80 = arith.constant 0 : index
      %292 = vector.load %arg11[%c0_79, %c0_80] : memref<2x32xf32, #tpu.memory_space<vmem>>, vector<2x32xf32>
      tpu.vector_store %arg11[%c0_79, %c0_80], %291 {strides = array<i32>} : memref<2x32xf32, #tpu.memory_space<vmem>>, vector<2x32xf32>,
    } else {
    }
    %c0 = arith.constant 0 : index
    %c0_1 = arith.constant 0 : index
    %c0_2 = arith.constant 0 : index
    %3 = vector.load %arg1[%c0, %c0_1, %c0_2] : memref<2x8x32xf32, #tpu.memory_space<vmem>>, vector<2x8x32xf32>
    %4 = vector.shape_cast %3 : vector<2x8x32xf32> to vector<16x32xf32>
    %c0_3 = arith.constant 0 : index
    %c0_4 = arith.constant 0 : index
    %5 = vector.load %arg3[%c0_3, %c0_4] : memref<32x96xf32, #tpu.memory_space<vmem>>, vector<32x96xf32>
    %cst = arith.constant dense<0.000000e+00> : vector<16x96xf32>
    %6 = tpu.matmul %4, %5, %cst {dimension_numbers = #tpu.dot_dimension_numbers<[1], [0], [0], [1], [0, 0, 1, 1], [], []>} : vector<16x32xf32>, vector<32x96xf32>, vector<16x96xf32> -> vector<16x96xf32>
    %c0_5 = arith.constant 0 : index
    %c0_6 = arith.constant 0 : index
    %7 = vector.load %arg4[%c0_5, %c0_6] : memref<1x96xf32, #tpu.memory_space<vmem>>, vector<1x96xf32>
    %8 = vector.broadcast %7 : vector<1x96xf32> to vector<16x96xf32>
    %9 = arith.addf %6, %8 : vector<16x96xf32>
    %10 = vector.shape_cast %9 : vector<16x96xf32> to vector<2x8x96xf32>
    %c0_7 = arith.constant 0 : index
    %c0_8 = arith.constant 0 : index
    %11 = vector.load %arg5[%c0_7, %c0_8] : memref<32x96xf32, #tpu.memory_space<vmem>>, vector<32x96xf32>
    %c0_9 = arith.constant 0 : index
    %c0_10 = arith.constant 0 : index
    %12 = vector.load %arg6[%c0_9, %c0_10] : memref<1x96xf32, #tpu.memory_space<vmem>>, vector<1x96xf32>
    %c0_11 = arith.constant 0 : index
    %c0_12 = arith.constant 0 : index
    %13 = vector.load %arg11[%c0_11, %c0_12] : memref<2x32xf32, #tpu.memory_space<vmem>>, vector<2x32xf32>
    %14 = vector.extract_strided_slice %10 {offsets = [0, 0, 0], sizes = [2, 1, 96], strides = [1, 1, 1]} : vector<2x8x96xf32> to vector<2x1x96xf32>
    %15 = vector.shape_cast %14 : vector<2x1x96xf32> to vector<2x96xf32>
    %cst_13 = arith.constant dense<0.000000e+00> : vector<2x96xf32>
    %16 = tpu.matmul %13, %11, %cst_13 {dimension_numbers = #tpu.dot_dimension_numbers<[1], [0], [0], [1], [0, 0, 1, 1], [], []>} : vector<2x32xf32>, vector<32x96xf32>, vector<2x96xf32> -> vector<2x96xf32>
    %17 = vector.broadcast %12 : vector<1x96xf32> to vector<2x96xf32>
    %18 = arith.addf %16, %17 : vector<2x96xf32>
    %19 = vector.extract_strided_slice %15 {offsets = [0, 0], sizes = [2, 32], strides = [1, 1]} : vector<2x96xf32> to vector<2x32xf32>
    %20 = vector.extract_strided_slice %18 {offsets = [0, 0], sizes = [2, 32], strides = [1, 1]} : vector<2x96xf32> to vector<2x32xf32>
    %21 = arith.addf %19, %20 : vector<2x32xf32>
    %22 = arith.negf %21 : vector<2x32xf32>
    %23 = math.exp %22 : vector<2x32xf32>
    %cst_14 = arith.constant 1.000000e+00 : f32
    %24 = vector.broadcast %cst_14 : f32 to vector<2x32xf32>
    %25 = arith.addf %24, %23 : vector<2x32xf32>
    %26 = arith.divf %24, %25 : vector<2x32xf32>
    %27 = vector.extract_strided_slice %15 {offsets = [0, 32], sizes = [2, 32], strides = [1, 1]} : vector<2x96xf32> to vector<2x32xf32>
    %28 = vector.extract_strided_slice %18 {offsets = [0, 32], sizes = [2, 32], strides = [1, 1]} : vector<2x96xf32> to vector<2x32xf32>
    %29 = arith.addf %27, %28 : vector<2x32xf32>
    %30 = arith.negf %29 : vector<2x32xf32>
    %31 = math.exp %30 : vector<2x32xf32>
    %cst_15 = arith.constant 1.000000e+00 : f32
    %32 = vector.broadcast %cst_15 : f32 to vector<2x32xf32>
    %33 = arith.addf %32, %31 : vector<2x32xf32>
    %34 = arith.divf %32, %33 : vector<2x32xf32>
    %35 = vector.extract_strided_slice %15 {offsets = [0, 64], sizes = [2, 32], strides = [1, 1]} : vector<2x96xf32> to vector<2x32xf32>
    %36 = vector.extract_strided_slice %18 {offsets = [0, 64], sizes = [2, 32], strides = [1, 1]} : vector<2x96xf32> to vector<2x32xf32>
    %37 = arith.mulf %26, %36 : vector<2x32xf32>
    %38 = arith.addf %35, %37 : vector<2x32xf32>
    %39 = math.tanh %38 : vector<2x32xf32>
    %cst_16 = arith.constant 1.000000e+00 : f32
    %40 = vector.broadcast %cst_16 : f32 to vector<2x32xf32>
    %41 = arith.subf %40, %34 : vector<2x32xf32>
    %42 = arith.mulf %41, %39 : vector<2x32xf32>
    %43 = arith.mulf %34, %13 : vector<2x32xf32>
    %44 = arith.addf %42, %43 : vector<2x32xf32>
    %45 = vector.shape_cast %44 : vector<2x32xf32> to vector<2x1x32xf32>
    %c0_17 = arith.constant 0 : index
    %c0_18 = arith.constant 0 : index
    %c0_19 = arith.constant 0 : index
    %46 = vector.load %arg12[%c0_17, %c0_18, %c0_19] : memref<2x8x32xf32, #tpu.memory_space<vmem>>, vector<2x1x32xf32>
    tpu.vector_store %arg12[%c0_17, %c0_18, %c0_19], %45 {strides = array<i32>} : memref<2x8x32xf32, #tpu.memory_space<vmem>>, vector<2x1x32xf32>,
    %47 = vector.extract_strided_slice %10 {offsets = [0, 1, 0], sizes = [2, 1, 96], strides = [1, 1, 1]} : vector<2x8x96xf32> to vector<2x1x96xf32>
    %48 = vector.shape_cast %47 : vector<2x1x96xf32> to vector<2x96xf32>
    %cst_20 = arith.constant dense<0.000000e+00> : vector<2x96xf32>
    %49 = tpu.matmul %44, %11, %cst_20 {dimension_numbers = #tpu.dot_dimension_numbers<[1], [0], [0], [1], [0, 0, 1, 1], [], []>} : vector<2x32xf32>, vector<32x96xf32>, vector<2x96xf32> -> vector<2x96xf32>
    %50 = vector.broadcast %12 : vector<1x96xf32> to vector<2x96xf32>
    %51 = arith.addf %49, %50 : vector<2x96xf32>
    %52 = vector.extract_strided_slice %48 {offsets = [0, 0], sizes = [2, 32], strides = [1, 1]} : vector<2x96xf32> to vector<2x32xf32>
    %53 = vector.extract_strided_slice %51 {offsets = [0, 0], sizes = [2, 32], strides = [1, 1]} : vector<2x96xf32> to vector<2x32xf32>
    %54 = arith.addf %52, %53 : vector<2x32xf32>
    %55 = arith.negf %54 : vector<2x32xf32>
    %56 = math.exp %55 : vector<2x32xf32>
    %cst_21 = arith.constant 1.000000e+00 : f32
    %57 = vector.broadcast %cst_21 : f32 to vector<2x32xf32>
    %58 = arith.addf %57, %56 : vector<2x32xf32>
    %59 = arith.divf %57, %58 : vector<2x32xf32>
    %60 = vector.extract_strided_slice %48 {offsets = [0, 32], sizes = [2, 32], strides = [1, 1]} : vector<2x96xf32> to vector<2x32xf32>
    %61 = vector.extract_strided_slice %51 {offsets = [0, 32], sizes = [2, 32], strides = [1, 1]} : vector<2x96xf32> to vector<2x32xf32>
    %62 = arith.addf %60, %61 : vector<2x32xf32>
    %63 = arith.negf %62 : vector<2x32xf32>
    %64 = math.exp %63 : vector<2x32xf32>
    %cst_22 = arith.constant 1.000000e+00 : f32
    %65 = vector.broadcast %cst_22 : f32 to vector<2x32xf32>
    %66 = arith.addf %65, %64 : vector<2x32xf32>
    %67 = arith.divf %65, %66 : vector<2x32xf32>
    %68 = vector.extract_strided_slice %48 {offsets = [0, 64], sizes = [2, 32], strides = [1, 1]} : vector<2x96xf32> to vector<2x32xf32>
    %69 = vector.extract_strided_slice %51 {offsets = [0, 64], sizes = [2, 32], strides = [1, 1]} : vector<2x96xf32> to vector<2x32xf32>
    %70 = arith.mulf %59, %69 : vector<2x32xf32>
    %71 = arith.addf %68, %70 : vector<2x32xf32>
    %72 = math.tanh %71 : vector<2x32xf32>
    %cst_23 = arith.constant 1.000000e+00 : f32
    %73 = vector.broadcast %cst_23 : f32 to vector<2x32xf32>
    %74 = arith.subf %73, %67 : vector<2x32xf32>
    %75 = arith.mulf %74, %72 : vector<2x32xf32>
    %76 = arith.mulf %67, %44 : vector<2x32xf32>
    %77 = arith.addf %75, %76 : vector<2x32xf32>
    %78 = vector.shape_cast %77 : vector<2x32xf32> to vector<2x1x32xf32>
    %c0_24 = arith.constant 0 : index
    %c1 = arith.constant 1 : index
    %c0_25 = arith.constant 0 : index
    %79 = vector.load %arg12[%c0_24, %c1, %c0_25] : memref<2x8x32xf32, #tpu.memory_space<vmem>>, vector<2x1x32xf32>
    tpu.vector_store %arg12[%c0_24, %c1, %c0_25], %78 {strides = array<i32>} : memref<2x8x32xf32, #tpu.memory_space<vmem>>, vector<2x1x32xf32>,
    %80 = vector.extract_strided_slice %10 {offsets = [0, 2, 0], sizes = [2, 1, 96], strides = [1, 1, 1]} : vector<2x8x96xf32> to vector<2x1x96xf32>
    %81 = vector.shape_cast %80 : vector<2x1x96xf32> to vector<2x96xf32>
    %cst_26 = arith.constant dense<0.000000e+00> : vector<2x96xf32>
    %82 = tpu.matmul %77, %11, %cst_26 {dimension_numbers = #tpu.dot_dimension_numbers<[1], [0], [0], [1], [0, 0, 1, 1], [], []>} : vector<2x32xf32>, vector<32x96xf32>, vector<2x96xf32> -> vector<2x96xf32>
    %83 = vector.broadcast %12 : vector<1x96xf32> to vector<2x96xf32>
    %84 = arith.addf %82, %83 : vector<2x96xf32>
    %85 = vector.extract_strided_slice %81 {offsets = [0, 0], sizes = [2, 32], strides = [1, 1]} : vector<2x96xf32> to vector<2x32xf32>
    %86 = vector.extract_strided_slice %84 {offsets = [0, 0], sizes = [2, 32], strides = [1, 1]} : vector<2x96xf32> to vector<2x32xf32>
    %87 = arith.addf %85, %86 : vector<2x32xf32>
    %88 = arith.negf %87 : vector<2x32xf32>
    %89 = math.exp %88 : vector<2x32xf32>
    %cst_27 = arith.constant 1.000000e+00 : f32
    %90 = vector.broadcast %cst_27 : f32 to vector<2x32xf32>
    %91 = arith.addf %90, %89 : vector<2x32xf32>
    %92 = arith.divf %90, %91 : vector<2x32xf32>
    %93 = vector.extract_strided_slice %81 {offsets = [0, 32], sizes = [2, 32], strides = [1, 1]} : vector<2x96xf32> to vector<2x32xf32>
    %94 = vector.extract_strided_slice %84 {offsets = [0, 32], sizes = [2, 32], strides = [1, 1]} : vector<2x96xf32> to vector<2x32xf32>
    %95 = arith.addf %93, %94 : vector<2x32xf32>
    %96 = arith.negf %95 : vector<2x32xf32>
    %97 = math.exp %96 : vector<2x32xf32>
    %cst_28 = arith.constant 1.000000e+00 : f32
    %98 = vector.broadcast %cst_28 : f32 to vector<2x32xf32>
    %99 = arith.addf %98, %97 : vector<2x32xf32>
    %100 = arith.divf %98, %99 : vector<2x32xf32>
    %101 = vector.extract_strided_slice %81 {offsets = [0, 64], sizes = [2, 32], strides = [1, 1]} : vector<2x96xf32> to vector<2x32xf32>
    %102 = vector.extract_strided_slice %84 {offsets = [0, 64], sizes = [2, 32], strides = [1, 1]} : vector<2x96xf32> to vector<2x32xf32>
    %103 = arith.mulf %92, %102 : vector<2x32xf32>
    %104 = arith.addf %101, %103 : vector<2x32xf32>
    %105 = math.tanh %104 : vector<2x32xf32>
    %cst_29 = arith.constant 1.000000e+00 : f32
    %106 = vector.broadcast %cst_29 : f32 to vector<2x32xf32>
    %107 = arith.subf %106, %100 : vector<2x32xf32>
    %108 = arith.mulf %107, %105 : vector<2x32xf32>
    %109 = arith.mulf %100, %77 : vector<2x32xf32>
    %110 = arith.addf %108, %109 : vector<2x32xf32>
    %111 = vector.shape_cast %110 : vector<2x32xf32> to vector<2x1x32xf32>
    %c0_30 = arith.constant 0 : index
    %c2 = arith.constant 2 : index
    %c0_31 = arith.constant 0 : index
    %112 = vector.load %arg12[%c0_30, %c2, %c0_31] : memref<2x8x32xf32, #tpu.memory_space<vmem>>, vector<2x1x32xf32>
    tpu.vector_store %arg12[%c0_30, %c2, %c0_31], %111 {strides = array<i32>} : memref<2x8x32xf32, #tpu.memory_space<vmem>>, vector<2x1x32xf32>,
    %113 = vector.extract_strided_slice %10 {offsets = [0, 3, 0], sizes = [2, 1, 96], strides = [1, 1, 1]} : vector<2x8x96xf32> to vector<2x1x96xf32>
    %114 = vector.shape_cast %113 : vector<2x1x96xf32> to vector<2x96xf32>
    %cst_32 = arith.constant dense<0.000000e+00> : vector<2x96xf32>
    %115 = tpu.matmul %110, %11, %cst_32 {dimension_numbers = #tpu.dot_dimension_numbers<[1], [0], [0], [1], [0, 0, 1, 1], [], []>} : vector<2x32xf32>, vector<32x96xf32>, vector<2x96xf32> -> vector<2x96xf32>
    %116 = vector.broadcast %12 : vector<1x96xf32> to vector<2x96xf32>
    %117 = arith.addf %115, %116 : vector<2x96xf32>
    %118 = vector.extract_strided_slice %114 {offsets = [0, 0], sizes = [2, 32], strides = [1, 1]} : vector<2x96xf32> to vector<2x32xf32>
    %119 = vector.extract_strided_slice %117 {offsets = [0, 0], sizes = [2, 32], strides = [1, 1]} : vector<2x96xf32> to vector<2x32xf32>
    %120 = arith.addf %118, %119 : vector<2x32xf32>
    %121 = arith.negf %120 : vector<2x32xf32>
    %122 = math.exp %121 : vector<2x32xf32>
    %cst_33 = arith.constant 1.000000e+00 : f32
    %123 = vector.broadcast %cst_33 : f32 to vector<2x32xf32>
    %124 = arith.addf %123, %122 : vector<2x32xf32>
    %125 = arith.divf %123, %124 : vector<2x32xf32>
    %126 = vector.extract_strided_slice %114 {offsets = [0, 32], sizes = [2, 32], strides = [1, 1]} : vector<2x96xf32> to vector<2x32xf32>
    %127 = vector.extract_strided_slice %117 {offsets = [0, 32], sizes = [2, 32], strides = [1, 1]} : vector<2x96xf32> to vector<2x32xf32>
    %128 = arith.addf %126, %127 : vector<2x32xf32>
    %129 = arith.negf %128 : vector<2x32xf32>
    %130 = math.exp %129 : vector<2x32xf32>
    %cst_34 = arith.constant 1.000000e+00 : f32
    %131 = vector.broadcast %cst_34 : f32 to vector<2x32xf32>
    %132 = arith.addf %131, %130 : vector<2x32xf32>
    %133 = arith.divf %131, %132 : vector<2x32xf32>
    %134 = vector.extract_strided_slice %114 {offsets = [0, 64], sizes = [2, 32], strides = [1, 1]} : vector<2x96xf32> to vector<2x32xf32>
    %135 = vector.extract_strided_slice %117 {offsets = [0, 64], sizes = [2, 32], strides = [1, 1]} : vector<2x96xf32> to vector<2x32xf32>
    %136 = arith.mulf %125, %135 : vector<2x32xf32>
    %137 = arith.addf %134, %136 : vector<2x32xf32>
    %138 = math.tanh %137 : vector<2x32xf32>
    %cst_35 = arith.constant 1.000000e+00 : f32
    %139 = vector.broadcast %cst_35 : f32 to vector<2x32xf32>
    %140 = arith.subf %139, %133 : vector<2x32xf32>
    %141 = arith.mulf %140, %138 : vector<2x32xf32>
    %142 = arith.mulf %133, %110 : vector<2x32xf32>
    %143 = arith.addf %141, %142 : vector<2x32xf32>
    %144 = vector.shape_cast %143 : vector<2x32xf32> to vector<2x1x32xf32>
    %c0_36 = arith.constant 0 : index
    %c3 = arith.constant 3 : index
    %c0_37 = arith.constant 0 : index
    %145 = vector.load %arg12[%c0_36, %c3, %c0_37] : memref<2x8x32xf32, #tpu.memory_space<vmem>>, vector<2x1x32xf32>
    tpu.vector_store %arg12[%c0_36, %c3, %c0_37], %144 {strides = array<i32>} : memref<2x8x32xf32, #tpu.memory_space<vmem>>, vector<2x1x32xf32>,
    %146 = vector.extract_strided_slice %10 {offsets = [0, 4, 0], sizes = [2, 1, 96], strides = [1, 1, 1]} : vector<2x8x96xf32> to vector<2x1x96xf32>
    %147 = vector.shape_cast %146 : vector<2x1x96xf32> to vector<2x96xf32>
    %cst_38 = arith.constant dense<0.000000e+00> : vector<2x96xf32>
    %148 = tpu.matmul %143, %11, %cst_38 {dimension_numbers = #tpu.dot_dimension_numbers<[1], [0], [0], [1], [0, 0, 1, 1], [], []>} : vector<2x32xf32>, vector<32x96xf32>, vector<2x96xf32> -> vector<2x96xf32>
    %149 = vector.broadcast %12 : vector<1x96xf32> to vector<2x96xf32>
    %150 = arith.addf %148, %149 : vector<2x96xf32>
    %151 = vector.extract_strided_slice %147 {offsets = [0, 0], sizes = [2, 32], strides = [1, 1]} : vector<2x96xf32> to vector<2x32xf32>
    %152 = vector.extract_strided_slice %150 {offsets = [0, 0], sizes = [2, 32], strides = [1, 1]} : vector<2x96xf32> to vector<2x32xf32>
    %153 = arith.addf %151, %152 : vector<2x32xf32>
    %154 = arith.negf %153 : vector<2x32xf32>
    %155 = math.exp %154 : vector<2x32xf32>
    %cst_39 = arith.constant 1.000000e+00 : f32
    %156 = vector.broadcast %cst_39 : f32 to vector<2x32xf32>
    %157 = arith.addf %156, %155 : vector<2x32xf32>
    %158 = arith.divf %156, %157 : vector<2x32xf32>
    %159 = vector.extract_strided_slice %147 {offsets = [0, 32], sizes = [2, 32], strides = [1, 1]} : vector<2x96xf32> to vector<2x32xf32>
    %160 = vector.extract_strided_slice %150 {offsets = [0, 32], sizes = [2, 32], strides = [1, 1]} : vector<2x96xf32> to vector<2x32xf32>
    %161 = arith.addf %159, %160 : vector<2x32xf32>
    %162 = arith.negf %161 : vector<2x32xf32>
    %163 = math.exp %162 : vector<2x32xf32>
    %cst_40 = arith.constant 1.000000e+00 : f32
    %164 = vector.broadcast %cst_40 : f32 to vector<2x32xf32>
    %165 = arith.addf %164, %163 : vector<2x32xf32>
    %166 = arith.divf %164, %165 : vector<2x32xf32>
    %167 = vector.extract_strided_slice %147 {offsets = [0, 64], sizes = [2, 32], strides = [1, 1]} : vector<2x96xf32> to vector<2x32xf32>
    %168 = vector.extract_strided_slice %150 {offsets = [0, 64], sizes = [2, 32], strides = [1, 1]} : vector<2x96xf32> to vector<2x32xf32>
    %169 = arith.mulf %158, %168 : vector<2x32xf32>
    %170 = arith.addf %167, %169 : vector<2x32xf32>
    %171 = math.tanh %170 : vector<2x32xf32>
    %cst_41 = arith.constant 1.000000e+00 : f32
    %172 = vector.broadcast %cst_41 : f32 to vector<2x32xf32>
    %173 = arith.subf %172, %166 : vector<2x32xf32>
    %174 = arith.mulf %173, %171 : vector<2x32xf32>
    %175 = arith.mulf %166, %143 : vector<2x32xf32>
    %176 = arith.addf %174, %175 : vector<2x32xf32>
    %177 = vector.shape_cast %176 : vector<2x32xf32> to vector<2x1x32xf32>
    %c0_42 = arith.constant 0 : index
    %c4 = arith.constant 4 : index
    %c0_43 = arith.constant 0 : index
    %178 = vector.load %arg12[%c0_42, %c4, %c0_43] : memref<2x8x32xf32, #tpu.memory_space<vmem>>, vector<2x1x32xf32>
    tpu.vector_store %arg12[%c0_42, %c4, %c0_43], %177 {strides = array<i32>} : memref<2x8x32xf32, #tpu.memory_space<vmem>>, vector<2x1x32xf32>,
    %179 = vector.extract_strided_slice %10 {offsets = [0, 5, 0], sizes = [2, 1, 96], strides = [1, 1, 1]} : vector<2x8x96xf32> to vector<2x1x96xf32>
    %180 = vector.shape_cast %179 : vector<2x1x96xf32> to vector<2x96xf32>
    %cst_44 = arith.constant dense<0.000000e+00> : vector<2x96xf32>
    %181 = tpu.matmul %176, %11, %cst_44 {dimension_numbers = #tpu.dot_dimension_numbers<[1], [0], [0], [1], [0, 0, 1, 1], [], []>} : vector<2x32xf32>, vector<32x96xf32>, vector<2x96xf32> -> vector<2x96xf32>
    %182 = vector.broadcast %12 : vector<1x96xf32> to vector<2x96xf32>
    %183 = arith.addf %181, %182 : vector<2x96xf32>
    %184 = vector.extract_strided_slice %180 {offsets = [0, 0], sizes = [2, 32], strides = [1, 1]} : vector<2x96xf32> to vector<2x32xf32>
    %185 = vector.extract_strided_slice %183 {offsets = [0, 0], sizes = [2, 32], strides = [1, 1]} : vector<2x96xf32> to vector<2x32xf32>
    %186 = arith.addf %184, %185 : vector<2x32xf32>
    %187 = arith.negf %186 : vector<2x32xf32>
    %188 = math.exp %187 : vector<2x32xf32>
    %cst_45 = arith.constant 1.000000e+00 : f32
    %189 = vector.broadcast %cst_45 : f32 to vector<2x32xf32>
    %190 = arith.addf %189, %188 : vector<2x32xf32>
    %191 = arith.divf %189, %190 : vector<2x32xf32>
    %192 = vector.extract_strided_slice %180 {offsets = [0, 32], sizes = [2, 32], strides = [1, 1]} : vector<2x96xf32> to vector<2x32xf32>
    %193 = vector.extract_strided_slice %183 {offsets = [0, 32], sizes = [2, 32], strides = [1, 1]} : vector<2x96xf32> to vector<2x32xf32>
    %194 = arith.addf %192, %193 : vector<2x32xf32>
    %195 = arith.negf %194 : vector<2x32xf32>
    %196 = math.exp %195 : vector<2x32xf32>
    %cst_46 = arith.constant 1.000000e+00 : f32
    %197 = vector.broadcast %cst_46 : f32 to vector<2x32xf32>
    %198 = arith.addf %197, %196 : vector<2x32xf32>
    %199 = arith.divf %197, %198 : vector<2x32xf32>
    %200 = vector.extract_strided_slice %180 {offsets = [0, 64], sizes = [2, 32], strides = [1, 1]} : vector<2x96xf32> to vector<2x32xf32>
    %201 = vector.extract_strided_slice %183 {offsets = [0, 64], sizes = [2, 32], strides = [1, 1]} : vector<2x96xf32> to vector<2x32xf32>
    %202 = arith.mulf %191, %201 : vector<2x32xf32>
    %203 = arith.addf %200, %202 : vector<2x32xf32>
    %204 = math.tanh %203 : vector<2x32xf32>
    %cst_47 = arith.constant 1.000000e+00 : f32
    %205 = vector.broadcast %cst_47 : f32 to vector<2x32xf32>
    %206 = arith.subf %205, %199 : vector<2x32xf32>
    %207 = arith.mulf %206, %204 : vector<2x32xf32>
    %208 = arith.mulf %199, %176 : vector<2x32xf32>
    %209 = arith.addf %207, %208 : vector<2x32xf32>
    %210 = vector.shape_cast %209 : vector<2x32xf32> to vector<2x1x32xf32>
    %c0_48 = arith.constant 0 : index
    %c5 = arith.constant 5 : index
    %c0_49 = arith.constant 0 : index
    %211 = vector.load %arg12[%c0_48, %c5, %c0_49] : memref<2x8x32xf32, #tpu.memory_space<vmem>>, vector<2x1x32xf32>
    tpu.vector_store %arg12[%c0_48, %c5, %c0_49], %210 {strides = array<i32>} : memref<2x8x32xf32, #tpu.memory_space<vmem>>, vector<2x1x32xf32>,
    %212 = vector.extract_strided_slice %10 {offsets = [0, 6, 0], sizes = [2, 1, 96], strides = [1, 1, 1]} : vector<2x8x96xf32> to vector<2x1x96xf32>
    %213 = vector.shape_cast %212 : vector<2x1x96xf32> to vector<2x96xf32>
    %cst_50 = arith.constant dense<0.000000e+00> : vector<2x96xf32>
    %214 = tpu.matmul %209, %11, %cst_50 {dimension_numbers = #tpu.dot_dimension_numbers<[1], [0], [0], [1], [0, 0, 1, 1], [], []>} : vector<2x32xf32>, vector<32x96xf32>, vector<2x96xf32> -> vector<2x96xf32>
    %215 = vector.broadcast %12 : vector<1x96xf32> to vector<2x96xf32>
    %216 = arith.addf %214, %215 : vector<2x96xf32>
    %217 = vector.extract_strided_slice %213 {offsets = [0, 0], sizes = [2, 32], strides = [1, 1]} : vector<2x96xf32> to vector<2x32xf32>
    %218 = vector.extract_strided_slice %216 {offsets = [0, 0], sizes = [2, 32], strides = [1, 1]} : vector<2x96xf32> to vector<2x32xf32>
    %219 = arith.addf %217, %218 : vector<2x32xf32>
    %220 = arith.negf %219 : vector<2x32xf32>
    %221 = math.exp %220 : vector<2x32xf32>
    %cst_51 = arith.constant 1.000000e+00 : f32
    %222 = vector.broadcast %cst_51 : f32 to vector<2x32xf32>
    %223 = arith.addf %222, %221 : vector<2x32xf32>
    %224 = arith.divf %222, %223 : vector<2x32xf32>
    %225 = vector.extract_strided_slice %213 {offsets = [0, 32], sizes = [2, 32], strides = [1, 1]} : vector<2x96xf32> to vector<2x32xf32>
    %226 = vector.extract_strided_slice %216 {offsets = [0, 32], sizes = [2, 32], strides = [1, 1]} : vector<2x96xf32> to vector<2x32xf32>
    %227 = arith.addf %225, %226 : vector<2x32xf32>
    %228 = arith.negf %227 : vector<2x32xf32>
    %229 = math.exp %228 : vector<2x32xf32>
    %cst_52 = arith.constant 1.000000e+00 : f32
    %230 = vector.broadcast %cst_52 : f32 to vector<2x32xf32>
    %231 = arith.addf %230, %229 : vector<2x32xf32>
    %232 = arith.divf %230, %231 : vector<2x32xf32>
    %233 = vector.extract_strided_slice %213 {offsets = [0, 64], sizes = [2, 32], strides = [1, 1]} : vector<2x96xf32> to vector<2x32xf32>
    %234 = vector.extract_strided_slice %216 {offsets = [0, 64], sizes = [2, 32], strides = [1, 1]} : vector<2x96xf32> to vector<2x32xf32>
    %235 = arith.mulf %224, %234 : vector<2x32xf32>
    %236 = arith.addf %233, %235 : vector<2x32xf32>
    %237 = math.tanh %236 : vector<2x32xf32>
    %cst_53 = arith.constant 1.000000e+00 : f32
    %238 = vector.broadcast %cst_53 : f32 to vector<2x32xf32>
    %239 = arith.subf %238, %232 : vector<2x32xf32>
    %240 = arith.mulf %239, %237 : vector<2x32xf32>
    %241 = arith.mulf %232, %209 : vector<2x32xf32>
    %242 = arith.addf %240, %241 : vector<2x32xf32>
    %243 = vector.shape_cast %242 : vector<2x32xf32> to vector<2x1x32xf32>
    %c0_54 = arith.constant 0 : index
    %c6 = arith.constant 6 : index
    %c0_55 = arith.constant 0 : index
    %244 = vector.load %arg12[%c0_54, %c6, %c0_55] : memref<2x8x32xf32, #tpu.memory_space<vmem>>, vector<2x1x32xf32>
    tpu.vector_store %arg12[%c0_54, %c6, %c0_55], %243 {strides = array<i32>} : memref<2x8x32xf32, #tpu.memory_space<vmem>>, vector<2x1x32xf32>,
    %245 = vector.extract_strided_slice %10 {offsets = [0, 7, 0], sizes = [2, 1, 96], strides = [1, 1, 1]} : vector<2x8x96xf32> to vector<2x1x96xf32>
    %246 = vector.shape_cast %245 : vector<2x1x96xf32> to vector<2x96xf32>
    %cst_56 = arith.constant dense<0.000000e+00> : vector<2x96xf32>
    %247 = tpu.matmul %242, %11, %cst_56 {dimension_numbers = #tpu.dot_dimension_numbers<[1], [0], [0], [1], [0, 0, 1, 1], [], []>} : vector<2x32xf32>, vector<32x96xf32>, vector<2x96xf32> -> vector<2x96xf32>
    %248 = vector.broadcast %12 : vector<1x96xf32> to vector<2x96xf32>
    %249 = arith.addf %247, %248 : vector<2x96xf32>
    %250 = vector.extract_strided_slice %246 {offsets = [0, 0], sizes = [2, 32], strides = [1, 1]} : vector<2x96xf32> to vector<2x32xf32>
    %251 = vector.extract_strided_slice %249 {offsets = [0, 0], sizes = [2, 32], strides = [1, 1]} : vector<2x96xf32> to vector<2x32xf32>
    %252 = arith.addf %250, %251 : vector<2x32xf32>
    %253 = arith.negf %252 : vector<2x32xf32>
    %254 = math.exp %253 : vector<2x32xf32>
    %cst_57 = arith.constant 1.000000e+00 : f32
    %255 = vector.broadcast %cst_57 : f32 to vector<2x32xf32>
    %256 = arith.addf %255, %254 : vector<2x32xf32>
    %257 = arith.divf %255, %256 : vector<2x32xf32>
    %258 = vector.extract_strided_slice %246 {offsets = [0, 32], sizes = [2, 32], strides = [1, 1]} : vector<2x96xf32> to vector<2x32xf32>
    %259 = vector.extract_strided_slice %249 {offsets = [0, 32], sizes = [2, 32], strides = [1, 1]} : vector<2x96xf32> to vector<2x32xf32>
    %260 = arith.addf %258, %259 : vector<2x32xf32>
    %261 = arith.negf %260 : vector<2x32xf32>
    %262 = math.exp %261 : vector<2x32xf32>
    %cst_58 = arith.constant 1.000000e+00 : f32
    %263 = vector.broadcast %cst_58 : f32 to vector<2x32xf32>
    %264 = arith.addf %263, %262 : vector<2x32xf32>
    %265 = arith.divf %263, %264 : vector<2x32xf32>
    %266 = vector.extract_strided_slice %246 {offsets = [0, 64], sizes = [2, 32], strides = [1, 1]} : vector<2x96xf32> to vector<2x32xf32>
    %267 = vector.extract_strided_slice %249 {offsets = [0, 64], sizes = [2, 32], strides = [1, 1]} : vector<2x96xf32> to vector<2x32xf32>
    %268 = arith.mulf %257, %267 : vector<2x32xf32>
    %269 = arith.addf %266, %268 : vector<2x32xf32>
    %270 = math.tanh %269 : vector<2x32xf32>
    %cst_59 = arith.constant 1.000000e+00 : f32
    %271 = vector.broadcast %cst_59 : f32 to vector<2x32xf32>
    %272 = arith.subf %271, %265 : vector<2x32xf32>
    %273 = arith.mulf %272, %270 : vector<2x32xf32>
    %274 = arith.mulf %265, %242 : vector<2x32xf32>
    %275 = arith.addf %273, %274 : vector<2x32xf32>
    %276 = vector.shape_cast %275 : vector<2x32xf32> to vector<2x1x32xf32>
    %c0_60 = arith.constant 0 : index
    %c7 = arith.constant 7 : index
    %c0_61 = arith.constant 0 : index
    %277 = vector.load %arg12[%c0_60, %c7, %c0_61] : memref<2x8x32xf32, #tpu.memory_space<vmem>>, vector<2x1x32xf32>
    tpu.vector_store %arg12[%c0_60, %c7, %c0_61], %276 {strides = array<i32>} : memref<2x8x32xf32, #tpu.memory_space<vmem>>, vector<2x1x32xf32>,
    %c0_62 = arith.constant 0 : index
    %c0_63 = arith.constant 0 : index
    %278 = vector.load %arg11[%c0_62, %c0_63] : memref<2x32xf32, #tpu.memory_space<vmem>>, vector<2x32xf32>
    tpu.vector_store %arg11[%c0_62, %c0_63], %275 {strides = array<i32>} : memref<2x32xf32, #tpu.memory_space<vmem>>, vector<2x32xf32>,
    %c0_64 = arith.constant 0 : index
    %c0_65 = arith.constant 0 : index
    %c0_66 = arith.constant 0 : index
    %279 = vector.load %arg12[%c0_64, %c0_65, %c0_66] : memref<2x8x32xf32, #tpu.memory_space<vmem>>, vector<2x8x32xf32>
    %280 = vector.shape_cast %279 : vector<2x8x32xf32> to vector<16x32xf32>
    %c0_67 = arith.constant 0 : index
    %c0_68 = arith.constant 0 : index
    %281 = vector.load %arg7[%c0_67, %c0_68] : memref<32x30xf32, #tpu.memory_space<vmem>>, vector<32x30xf32>
    %cst_69 = arith.constant dense<0.000000e+00> : vector<16x30xf32>
    %282 = tpu.matmul %280, %281, %cst_69 {dimension_numbers = #tpu.dot_dimension_numbers<[1], [0], [0], [1], [0, 0, 1, 1], [], []>} : vector<16x32xf32>, vector<32x30xf32>, vector<16x30xf32> -> vector<16x30xf32>
    %c0_70 = arith.constant 0 : index
    %c0_71 = arith.constant 0 : index
    %283 = vector.load %arg8[%c0_70, %c0_71] : memref<1x30xf32, #tpu.memory_space<vmem>>, vector<1x30xf32>
    %284 = vector.broadcast %283 : vector<1x30xf32> to vector<16x30xf32>
    %285 = arith.addf %282, %284 : vector<16x30xf32>
    %286 = vector.shape_cast %285 : vector<16x30xf32> to vector<2x8x30xf32>
    %c0_72 = arith.constant 0 : index
    %c0_73 = arith.constant 0 : index
    %c0_74 = arith.constant 0 : index
    %287 = vector.load %arg9[%c0_72, %c0_73, %c0_74] : memref<2x8x30xf32, #tpu.memory_space<vmem>>, vector<2x8x30xf32>
    tpu.vector_store %arg9[%c0_72, %c0_73, %c0_74], %286 {strides = array<i32>} : memref<2x8x30xf32, #tpu.memory_space<vmem>>, vector<2x8x30xf32>,
    %c0_i32_75 = arith.constant 0 : i32
    %288 = arith.cmpi eq, %arg0, %c0_i32_75 : i32
    %289 = arith.extui %288 : i1 to i32
    %c0_i32_76 = arith.constant 0 : i32
    %290 = arith.cmpi ne, %289, %c0_i32_76 : i32
    scf.if %290 {
      %c0_77 = arith.constant 0 : index
      %c0_78 = arith.constant 0 : index
      %291 = vector.load %arg10[%c0_77, %c0_78] : memref<2x32xf32, #tpu.memory_space<vmem>>, vector<2x32xf32>
      tpu.vector_store %arg10[%c0_77, %c0_78], %275 {strides = array<i32>} : memref<2x32xf32, #tpu.memory_space<vmem>>, vector<2x32xf32>,
    } else {
    }
    return
  }
  func.func @transform_0(%arg0: i32) -> (i32, i32, i32) {
    %c0_i32 = arith.constant 0 : i32
    %c0_i32_0 = arith.constant 0 : i32
    %c0_i32_1 = arith.constant 0 : i32
    return %c0_i32, %arg0, %c0_i32_0 : i32, i32, i32
  }
  func.func @transform_1(%arg0: i32) -> (i32, i32) {
    %c0_i32 = arith.constant 0 : i32
    %c0_i32_0 = arith.constant 0 : i32
    %c0_i32_1 = arith.constant 0 : i32
    return %c0_i32, %c0_i32_0 : i32, i32
  }
  func.func @transform_2(%arg0: i32) -> (i32, i32) {
    %c0_i32 = arith.constant 0 : i32
    %c0_i32_0 = arith.constant 0 : i32
    %c0_i32_1 = arith.constant 0 : i32
    return %c0_i32, %c0_i32_0 : i32, i32
  }
  func.func @transform_3(%arg0: i32) -> (i32, i32) {
    %c0_i32 = arith.constant 0 : i32
    %c0_i32_0 = arith.constant 0 : i32
    %c0_i32_1 = arith.constant 0 : i32
    return %c0_i32, %c0_i32_0 : i32, i32
  }
  func.func @transform_4(%arg0: i32) -> (i32, i32) {
    %c0_i32 = arith.constant 0 : i32
    %c0_i32_0 = arith.constant 0 : i32
    %c0_i32_1 = arith.constant 0 : i32
    return %c0_i32, %c0_i32_0 : i32, i32
  }
  func.func @transform_5(%arg0: i32) -> (i32, i32) {
    %c0_i32 = arith.constant 0 : i32
    %c0_i32_0 = arith.constant 0 : i32
    %c0_i32_1 = arith.constant 0 : i32
    return %c0_i32, %c0_i32_0 : i32, i32
  }
  func.func @transform_6(%arg0: i32) -> (i32, i32) {
    %c0_i32 = arith.constant 0 : i32
    %c0_i32_0 = arith.constant 0 : i32
    %c0_i32_1 = arith.constant 0 : i32
    return %c0_i32, %c0_i32_0 : i32, i32
  }
  func.func @transform_7(%arg0: i32) -> (i32, i32) {
    %c0_i32 = arith.constant 0 : i32
    %c0_i32_0 = arith.constant 0 : i32
    %c0_i32_1 = arith.constant 0 : i32
    return %c0_i32, %c0_i32_0 : i32, i32
  }
  func.func @transform_8(%arg0: i32) -> (i32, i32, i32) {
    %c0_i32 = arith.constant 0 : i32
    %c0_i32_0 = arith.constant 0 : i32
    %c0_i32_1 = arith.constant 0 : i32
    return %c0_i32, %arg0, %c0_i32_0 : i32, i32, i32
  }
  func.func @transform_9(%arg0: i32) -> (i32, i32) {
    %c0_i32 = arith.constant 0 : i32
    %c0_i32_0 = arith.constant 0 : i32
    %c0_i32_1 = arith.constant 0 : i32
    return %c0_i32, %c0_i32_0 : i32, i32
  }
}

</mosaic_0001>

<bundles_post_ra>
// kernel: tpu_custom_call.1
= control target key start
LH: loop header
LB: loop body
LE: loop exit
PB: predicated region body
PF: predicated region fallthrough
CT: control target
= control target key end

     0   :  { %15 = vsyncpa [#allocation5], 0  ;;  %s2474_s0 = inlined_call_operand.hbm [shape: f32[2,8,32], index: 0, kind: input, shape index: {}]   ;;  %s2475_s1 = inlined_call_operand.vmem [shape: f32[2,32], index: 1, kind: input, shape index: {}]   ;;  %s2476_s2 = inlined_call_operand.hbm [shape: f32[32,96], index: 2, kind: input, shape index: {}]   ;;  %s2477_s3 = inlined_call_operand.vmem [shape: f32[1,96], index: 3, kind: input, shape index: {}]   ;;  %s2478_s4 = inlined_call_operand.hbm [shape: f32[32,96], index: 4, kind: input, shape index: {}]   ;;  %s2479_s5 = inlined_call_operand.vmem [shape: f32[1,96], index: 5, kind: input, shape index: {}]   ;;  %s2480_s6 = inlined_call_operand.hbm [shape: f32[32,30], index: 6, kind: input, shape index: {}]   ;;  %s2481_s7 = inlined_call_operand.vmem [shape: f32[1,30], index: 7, kind: input, shape index: {}]   ;;  %s2482_s8 = inlined_call_operand.hbm [shape: f32[2,8,30], index: 8, kind: output, shape index: {0}]   ;;  %s2483_s9 = inlined_call_operand.hbm [shape: f32[2,32], index: 9, kind: output, shape index: {1}]  }
   0x1   :  { %16 = vsyncpa [#allocation8], 0 }
   0x2   :  { %17 = vsyncpa [#allocation11], 0 }
   0x3   :  { %18 = vsyncpa [#allocation6], 0 }
   0x4   :  { %19 = vsyncpa [#allocation14], 0  ;;  %s2023_s30 = smov [#allocation7]   ;;  %s2024_s11 = smov [#allocation4]  }
   0x5   :  { %s39_s10 = sshll.u32 %s2023_s30, 4  ;;  %s25_s12 = sshll.u32 %s2024_s11, 4  ;;  %s40_s10 = int_to_ptr.vmem [resolvable:$true] %s39_s10  ;;  %s2087_s12 = int_to_ptr.vmem [resolvable:$true] %s25_s12 }
   0x6   :  { %s1881_s15 = scalar_lea.hbm %s2476_s2, 512 }
   0x7   :  { %p1882_p0 = scmp.ne.s32.totalorder %s2476_s2, %s1881_s15  ;;  %p1885_p1 = scmp.lt.u32.totalorder %s1881_s15, %s2476_s2 }
   0x9   :  { %p1887_p2 = pnand %p1885_p1, %p1882_p0 }
   0xb   :  { %1890 = shalt.err (!%p1887_p2)
}
   0xc   :  { %s1891_s20 = scalar_lea.vmem %s40_s10, 512  ;;  %p1896_p4 = scmp.lt.s32.totalorder %s40_s10, %s40_s10 }
   0xd   :  { %p1892_p3 = scmp.ne.s32.totalorder %s40_s10, %s1891_s20  ;;  %p1897_p5 = scmp.lt.s32.totalorder %s1891_s20, %s1891_s20 }
   0xf   :  { %p1898_p6 = por %p1897_p5, %p1896_p4 }
  0x11   :  { %p1899_p7 = pnand %p1898_p6, %p1892_p3 }
  0x13   :  { %1902 = shalt.err (!%p1899_p7)
}
  0x14   :  { %s2025_s21 = smov 128   ;;  %s2026_s22 = smov 8  }
  0x15   :  { %45 = dma.hbm_to_vmem [thread:$0]  %s2476_s2, 512, %s40_s10, [#allocation8], %s2025_s21, %s2025_s21, %s2026_s22  }
  0x16   :  { %s1903_s27 = scalar_lea.hbm %s2474_s0, 256 }
  0x17   :  { %p1904_p8 = scmp.ne.s32.totalorder %s2474_s0, %s1903_s27  ;;  %p1907_p9 = scmp.lt.u32.totalorder %s1903_s27, %s2474_s0 }
  0x19   :  { %p1909_p10 = pnand %p1907_p9, %p1904_p8 }
  0x1b   :  { %1912 = shalt.err (!%p1909_p10)
}
  0x1c   :  { %s1913_s13 = scalar_lea.vmem %s2087_s12, 256  ;;  %p1918_p12 = scmp.lt.s32.totalorder %s2087_s12, %s2087_s12 }
  0x1d   :  { %p1914_p11 = scmp.ne.s32.totalorder %s2087_s12, %s1913_s13  ;;  %p1919_p13 = scmp.lt.s32.totalorder %s1913_s13, %s1913_s13 }
  0x1f   :  { %p1920_p0 = por %p1919_p13, %p1918_p12 }
  0x21   :  { %p1921_p1 = pnand %p1920_p0, %p1914_p11 }
  0x23   :  { %1924 = shalt.err (!%p1921_p1)
}
  0x24   :  { %31 = dma.hbm_to_vmem [thread:$0]  %s2474_s0, 256, %s2087_s12, [#allocation5], %s2025_s21, %s2025_s21, %s2026_s22  }
  0x25   :  { %s2027_s14 = smov [#allocation9]   ;;  %s2028_s16 = smov [#allocation10]  }
  0x26   :  { %s53_s15 = sshll.u32 %s2027_s14, 4  ;;  %s67_s17 = sshll.u32 %s2028_s16, 4  ;;  %s54_s15 = int_to_ptr.vmem [resolvable:$true] %s53_s15  ;;  %s2124_s17 = int_to_ptr.vmem [resolvable:$true] %s67_s17 }
  0x27   :  { %s1925_s20 = scalar_lea.hbm %s2478_s4, 512 }
  0x28   :  { %p1926_p2 = scmp.ne.s32.totalorder %s2478_s4, %s1925_s20  ;;  %p1929_p3 = scmp.lt.u32.totalorder %s1925_s20, %s2478_s4 }
  0x2a   :  { %p1931_p4 = pnand %p1929_p3, %p1926_p2 }
  0x2c   :  { %1934 = shalt.err (!%p1931_p4)
}
  0x2d   :  { %s1935_s0 = scalar_lea.vmem %s54_s15, 512  ;;  %p1940_p6 = scmp.lt.s32.totalorder %s54_s15, %s54_s15 }
  0x2e   :  { %p1936_p5 = scmp.ne.s32.totalorder %s54_s15, %s1935_s0  ;;  %p1941_p7 = scmp.lt.s32.totalorder %s1935_s0, %s1935_s0 }
  0x30   :  { %p1942_p8 = por %p1941_p7, %p1940_p6 }
  0x32   :  { %p1943_p9 = pnand %p1942_p8, %p1936_p5 }
  0x34   :  { %1946 = shalt.err (!%p1943_p9)
}
  0x35   :  { %59 = dma.hbm_to_vmem [thread:$0]  %s2478_s4, 512, %s54_s15, [#allocation8], %s2025_s21, %s2025_s21, %s2026_s22  }
  0x36   :  { %s1947_s30 = scalar_lea.hbm %s2480_s6, 512 }
  0x37   :  { %p1948_p10 = scmp.ne.s32.totalorder %s2480_s6, %s1947_s30  ;;  %p1951_p11 = scmp.lt.u32.totalorder %s1947_s30, %s2480_s6 }
  0x39   :  { %p1953_p12 = pnand %p1951_p11, %p1948_p10 }
  0x3b   :  { %1956 = shalt.err (!%p1953_p12)
}
  0x3c   :  { %s1957_s14 = scalar_lea.vmem %s2124_s17, 512  ;;  %p1962_p0 = scmp.lt.s32.totalorder %s2124_s17, %s2124_s17 }
  0x3d   :  { %p1958_p13 = scmp.ne.s32.totalorder %s2124_s17, %s1957_s14  ;;  %p1963_p1 = scmp.lt.s32.totalorder %s1957_s14, %s1957_s14 }
  0x3f   :  { %p1964_p2 = por %p1963_p1, %p1962_p0 }
  0x41   :  { %p1965_p3 = pnand %p1964_p2, %p1958_p13 }
  0x43   :  { %1968 = shalt.err (!%p1965_p3)
}
  0x44   :  { %73 = dma.hbm_to_vmem [thread:$0]  %s2480_s6, 512, %s2124_s17, [#allocation11], %s2025_s21, %s2025_s21, %s2026_s22  }
  0x45   :  { %2013 = dma.done.wait [#allocation5], 256  }
  0x46   :  { %2014 = vsyncadd [#allocation5], 4294967040 }
  0x47   :  { %2015 = dma.done.wait [#allocation8], 1024  }
  0x48   :  { %2016 = vsyncadd [#allocation8], 4294966272 }
  0x49   :  { %2017 = dma.done.wait [#allocation11], 512  }
  0x4a   :  { %2018 = vsyncadd [#allocation11], 4294966784  ;;  %v2029_v0 = vmov 0.0|0.0   ;;  %vm2030_vm0 = vmmov 0   ;;  %v2031_v1 = vmov 0.0   ;;  %v97_v2 = vld [vmem:[#allocation7] sm:$0xff] }
  0x4b   :  { %1715 = vmatprep.subr.bf16.mxu1 %v2029_v0  ;;  %1616 = vmatprep.mubr.msk.f32.mxu1 %vm2030_vm0, %v2031_v1  ;;  %v98_v3 = vld [vmem:[#allocation7 + $0x8] sm:$0xff]  ;;  %v190_v4 = vld [vmem:[#allocation9] sm:$0xff]  ;;  %vm108_vm1 = vcmask 261120   ;;  %v99_v7 = vld [vmem:[#allocation7 + $0x10] sm:$0xff]  ;;  %vm93_vm2 = vcmask 254976   ;;  %s2032_s18 = smov 64  }
  0x4c   :  { %v1707_v5 = vpack.c.bf16 %v98_v3, %v97_v2  ;;  %v191_v6 = vld [vmem:[#allocation9 + $0x8] sm:$0xff]  ;;  %v100_v8 = vld [vmem:[#allocation7 + $0x18] sm:$0xff]  ;;  %v192_v11 = vld [vmem:[#allocation9 + $0x10] sm:$0xff]  ;;  %vm348_vm3 = vcmask 1041409   ;;  %vm489_vm4 = vcmask 254977   ;;  %vm344_vm5 = vcmask 253952  }
  0x4d   :  { %v2164_v9 = vpack.c.bf16 %v191_v6, %v190_v4  ;;  %v1711_v10 = vpack.c.bf16 %v100_v8, %v99_v7  ;;  %v193_v12 = vld [vmem:[#allocation9 + $0x18] sm:$0xff]  ;;  %v95_v13 = vld [vmem:[#allocation4] sm:$0xff]  ;;  %vm782_vm6 = vcmask 257027   ;;  %vm635_vm7 = vcmask 256002   ;;  %s2035_s23 = smov [#allocation13]  }
  0x4e   :  { %1708 = vmatprep.subr.bf16.mxu0 %v1707_v5  ;;  %1605 = vmatprep.mubr.msk.f32.mxu0 %vm108_vm1, %v95_v13  ;;  %v92_v14 = vld [vmem:[%s2475_s1] sm:$0x3]  ;;  %v2171_v15 = vpack.c.bf16 %v193_v12, %v192_v11  ;;  %vm1076_vm8 = vcmask 259077   ;;  %vm929_vm9 = vcmask 258052   ;;  %vm1223_vm10 = vcmask 260102   ;;  %s1499_s24 = sshll.u32 %s2035_s23, 4  ;;  %s1500_s24 = int_to_ptr.vmem [resolvable:$true] %s1499_s24 }
  0x4f   :  { %1717 = vmatpush3.bf16.msra.mxu1 %v2164_v9  ;;  %1710 = vmatpush3.bf16.msra.mxu0 %v1707_v5  ;;  %94 = vst.msk [vmem:[#allocation2] sm:$0x3] %vm93_vm2, %v92_v14  ;;  %v96_v16 = vld [vmem:[#allocation4 + $0x8] sm:$0xff]  ;;  %vm1370_vm11 = vcmask 261127   ;;  %s1969_s25 = scalar_lea.vmem %s1500_s24, 32  ;;  %p1974_p5 = scmp.lt.s32.totalorder %s1500_s24, %s1500_s24 }
  0x50   :  { %1718 = vmatprep.subr.bf16.mxu1 %v2029_v0  ;;  %1712 = vmatprep.subr.bf16.mxu0 %v1711_v10  ;;  %v2194_v18 = vld [vmem:[%s2479_s5] ss:$0 sm:$0xff]  ;;  %s2034_s5 = smov 96   ;;  %p1970_p4 = scmp.ne.s32.totalorder %s1500_s24, %s1969_s25 }
  0x51   :  { %v1514_v25 = vld [vmem:[%s2477_s3] ss:$0 sm:$0xff]  ;;  %s2033_s3 = smov 32   ;;  %p1975_p6 = scmp.lt.s32.totalorder %s1969_s25, %s1969_s25 }
  0x53   :  { %1720 = vmatpush3.bf16.msra.mxu1 %v2171_v15  ;;  %1714 = vmatpush3.bf16.msra.mxu0 %v1711_v10  ;;  %p1976_p7 = por %p1975_p6, %p1974_p5 }
  0x54   :  { %1721 = vmatprep.subr.bf16.mxu0 %v2029_v0  ;;  %1727 = vmatprep.subr.bf16.mxu1 %v2029_v0 }
  0x55   :  { %p1977_p8 = pnand %p1976_p7, %p1970_p4 }
  0x56   :  { %v195_v17 = vld [vmem:[#allocation2] sm:$0x3]  ;;  %1606 = vmatmul.mubr.msk.f32.vlgmr.msra.gmra.mrb[0].mxu0 %vm108_vm1, %v96_v16 }
  0x57   :  { %1617 = vmatmul.mubr.msk.f32.vlgmr.msra.gmra.mrb[0].mxu1 %vm108_vm1, %v195_v17  ;;  %1723 = vmatpush3.bf16.msra.mxu0 %v2164_v9  ;;  %v325_v42 = vrot.slane %v195_v17, 1 }
  0x58   :  { %1724 = vmatprep.subr.bf16.mxu0 %v2029_v0  ;;  %1627 = vmatprep.mubr.msk.f32.mxu0 %vm2030_vm0, %v2031_v1 }
  0x59   :  { %1729 = vmatpush3.bf16.msra.mxu1 %v2164_v9  ;;  %1638 = vmatprep.mubr.msk.f32.mxu1 %vm2030_vm0, %v2031_v1 }
  0x5a   :  { %1730 = vmatprep.subr.bf16.mxu1 %v2029_v0 }
  0x5b   :  { %1726 = vmatpush3.bf16.msra.mxu0 %v2171_v15 }
  0x5c   :  { %1733 = vmatprep.subr.bf16.mxu0 %v2029_v0 }
  0x5d   :  { %1732 = vmatpush3.bf16.msra.mxu1 %v2171_v15 }
  0x5e   :  { %1739 = vmatprep.subr.bf16.mxu1 %v2029_v0 }
 0x129   :  { %v1607_v19 = vpop.f32.mrb[0].mxu0 }
 0x12a   :  { %v271_v20 = vpop.f32.mrb[0].mxu1  ;;  %v181_v21 = vpop.f32.mrb[1].mxu0  ;;  %v2202_v26 = vadd.f32 %v1607_v19, %v1514_v25 }
 0x12b   :  { %v272_v22 = vadd.f32 %v2194_v18, %v271_v20  ;;  %v1618_v23 = vpop.f32.mrb[1].mxu1  ;;  %v2204_v27 = vadd.f32 %v1514_v25, %v181_v21 }
 0x12d   :  { %v276_v24 = vrot.slane %v272_v22, 1  ;;  %v279_v30 = vadd.f32 %v272_v22, %v2204_v27 }
 0x12f   :  { %295 = vrot.lane.b32.xlu0 %v276_v24, %s2032_s18  ;;  %v280_v28 = vadd.f32 %v276_v24, %v2202_v26  ;;  %v1519_v31 = vmul.f32 -1.442695, %v279_v30 }
 0x131   :  { %v1520_v29 = vmul.f32 -1.442695, %v280_v28 }
 0x133   :  { %293 = vrot.lane.b32.xlu0 %v272_v22, %s2032_s18  ;;  %1785 = vpow2.f32 %v1520_v29 }
 0x134   :  { %1787 = vpow2.f32 %v1519_v31 }
 0x13d   :  { %v1786_v32 = vpop.eup %1785 }
 0x13e   :  { %v288_v33 = vadd.f32 1.0, %v1786_v32  ;;  %v1788_v34 = vpop.eup %1787 }
 0x13f   :  { %v287_v35 = vadd.f32 1.0, %v1788_v34 }
 0x140   :  { %1789 = vrcp.f32 %v288_v33 }
 0x141   :  { %1791 = vrcp.f32 %v287_v35 }
 0x14a   :  { %v1790_v36 = vpop.eup %1789 }
 0x14b   :  { %v1792_v39 = vpop.eup %1791  ;;  %v314_v50 = vsub.f32 1.0, %v1790_v36 }
 0x14c   :  { %v313_v56 = vsub.f32 1.0, %v1792_v39 }
 0x1a1   :  { %v296_v37 = vpop.permute.xlu0 %295 }
 0x1a2   :  { %v300_v38 = vmul.f32 %v1790_v36, %v296_v37 }
 0x1a4   :  { %305 = vrot.lane.b32.xlu1 %v300_v38, %s2032_s18 }
 0x1a5   :  { %v294_v40 = vpop.permute.xlu0 %293 }
 0x1a6   :  { %v299_v41 = vmul.f32 %v1792_v39, %v294_v40 }
 0x1a8   :  { %303 = vrot.lane.b32.xlu1 %v299_v41, %s2032_s18 }
 0x1ac   :  { %328 = vrot.lane.b32.xlu1 %v325_v42, %s2033_s3 }
 0x1b0   :  { %326 = vrot.lane.b32.xlu1 %v195_v17, %s2033_s3 }
 0x216   :  { %v306_v43 = vpop.permute.xlu1 %305 }
 0x217   :  { %v310_v44 = vadd.f32 %v306_v43, %v2202_v26 }
 0x219   :  { %1793 = vtanh.f32 %v310_v44 }
 0x21a   :  { %v304_v45 = vpop.permute.xlu1 %303 }
 0x21b   :  { %v309_v46 = vadd.f32 %v304_v45, %v2204_v27 }
 0x21d   :  { %1795 = vtanh.f32 %v309_v46 }
 0x21e   :  { %v329_v49 = vpop.permute.xlu1 %328 }
 0x21f   :  { %v333_v52 = vmul.f32 %v1790_v36, %v329_v49 }
 0x222   :  { %v327_v54 = vpop.permute.xlu1 %326 }
 0x223   :  { %v1794_v47 = vpop.eup %1793  ;;  %v332_v58 = vmul.f32 %v1792_v39, %v327_v54 }
 0x224   :  { %319 = vrot.lane.b32.xlu0 %v1794_v47, %s2034_s5 }
 0x227   :  { %v1796_v48 = vpop.eup %1795 }
 0x228   :  { %317 = vrot.lane.b32.xlu0 %v1796_v48, %s2034_s5 }
 0x296   :  { %v320_v51 = vpop.permute.xlu0 %319 }
 0x297   :  { %v324_v53 = vmul.f32 %v320_v51, %v314_v50 }
 0x299   :  { %v2214_v55 = vadd.f32 %v333_v52, %v324_v53 }
 0x29a   :  { %v318_v57 = vpop.permute.xlu0 %317 }
 0x29b   :  { %v323_v59 = vmul.f32 %v318_v57, %v313_v56  ;;  %v347_v60 = vrot.slane %v2214_v55, 7 }
 0x29d   :  { %v2217_v61 = vadd.f32 %v332_v58, %v323_v59 }
 0x29f   :  { %v349_v62 = vsel %vm348_vm3, %v347_v60, %v2217_v61  ;;  %v474_v34 = vrot.slane %v2217_v61, 7 }
 0x2a0   :  { %350 = vrot.lane.b32.xlu0 %v349_v62, %s2034_s5 }
 0x312   :  { %v351_v63 = vpop.permute.xlu0 %350 }
 0x313   :  { %1628 = vmatmul.mubr.msk.f32.vlgmr.msra.gmra.mrb[2].mxu0 %vm108_vm1, %v351_v63 }
 0x314   :  { %1735 = vmatpush3.bf16.msra.mxu0 %v2164_v9  ;;  %1649 = vmatprep.mubr.msk.f32.mxu0 %vm2030_vm0, %v2031_v1 }
 0x315   :  { %1736 = vmatprep.subr.bf16.mxu0 %v2029_v0 }
 0x318   :  { %1738 = vmatpush3.bf16.msra.mxu0 %v2171_v15 }
 0x319   :  { %1745 = vmatprep.subr.bf16.mxu0 %v2029_v0 }
 0x3e6   :  { %v420_v2 = vpop.f32.mrb[2].mxu0 }
 0x3e7   :  { %v421_v3 = vadd.f32 %v2194_v18, %v420_v2  ;;  %v1629_v4 = vpop.f32.mrb[3].mxu0 }
 0x3e9   :  { %444 = vrot.lane.b32.xlu0 %v421_v3, %s2032_s18  ;;  %v425_v5 = vrot.slane %v421_v3, 7  ;;  %v429_v6 = vadd.f32 %v421_v3, %v2202_v26 }
 0x3eb   :  { %442 = vrot.lane.b32.xlu1 %v425_v5, %s2032_s18  ;;  %v428_v7 = vadd.f32 %v425_v5, %v2204_v27  ;;  %v1523_v8 = vmul.f32 -1.442695, %v429_v6 }
 0x3ed   :  { %v1522_v10 = vmul.f32 -1.442695, %v428_v7  ;;  %1797 = vpow2.f32 %v1523_v8 }
 0x3ef   :  { %1799 = vpow2.f32 %v1522_v10 }
 0x3f7   :  { %v1798_v11 = vpop.eup %1797 }
 0x3f8   :  { %v437_v13 = vadd.f32 1.0, %v1798_v11 }
 0x3f9   :  { %v1800_v12 = vpop.eup %1799 }
 0x3fa   :  { %v436_v14 = vadd.f32 1.0, %v1800_v12  ;;  %1801 = vrcp.f32 %v437_v13 }
 0x3fc   :  { %1803 = vrcp.f32 %v436_v14 }
 0x404   :  { %v1802_v16 = vpop.eup %1801 }
 0x405   :  { %v463_v32 = vsub.f32 1.0, %v1802_v16  ;;  %v478_v39 = vmul.f32 %v1802_v16, %v347_v60 }
 0x406   :  { %v1804_v20 = vpop.eup %1803 }
 0x407   :  { %v462_v33 = vsub.f32 1.0, %v1804_v20  ;;  %v477_v37 = vmul.f32 %v1804_v20, %v474_v34 }
 0x45b   :  { %v445_v17 = vpop.permute.xlu0 %444 }
 0x45c   :  { %v449_v19 = vmul.f32 %v1802_v16, %v445_v17 }
 0x45d   :  { %v443_v21 = vpop.permute.xlu1 %442 }
 0x45e   :  { %v448_v22 = vmul.f32 %v1804_v20, %v443_v21  ;;  %454 = vrot.lane.b32.xlu0 %v449_v19, %s2032_s18 }
 0x460   :  { %452 = vrot.lane.b32.xlu1 %v448_v22, %s2032_s18 }
 0x4d0   :  { %v455_v23 = vpop.permute.xlu0 %454 }
 0x4d1   :  { %v459_v24 = vadd.f32 %v455_v23, %v2202_v26 }
 0x4d2   :  { %v453_v25 = vpop.permute.xlu1 %452 }
 0x4d3   :  { %1805 = vtanh.f32 %v459_v24  ;;  %v458_v28 = vadd.f32 %v453_v25, %v2204_v27 }
 0x4d5   :  { %1807 = vtanh.f32 %v458_v28 }
 0x4dd   :  { %v1806_v29 = vpop.eup %1805 }
 0x4de   :  { %468 = vrot.lane.b32.xlu0 %v1806_v29, %s2034_s5 }
 0x4df   :  { %v1808_v30 = vpop.eup %1807 }
 0x4e0   :  { %466 = vrot.lane.b32.xlu1 %v1808_v30, %s2034_s5 }
 0x550   :  { %v469_v31 = vpop.permute.xlu0 %468 }
 0x551   :  { %v473_v36 = vmul.f32 %v469_v31, %v463_v32 }
 0x552   :  { %v467_v35 = vpop.permute.xlu1 %466 }
 0x553   :  { %v472_v38 = vmul.f32 %v467_v35, %v462_v33  ;;  %v2243_v41 = vadd.f32 %v478_v39, %v473_v36 }
 0x555   :  { %v2241_v40 = vadd.f32 %v477_v37, %v472_v38  ;;  %v620_v12 = vrot.slane %v2243_v41, 7 }
 0x557   :  { %v492_v42 = vrot.slane %v2241_v40, 1  ;;  %v619_v16 = vrot.slane %v2241_v40, 7 }
 0x559   :  { %v493_v43 = vsel %vm348_vm3, %v2243_v41, %v492_v42 }
 0x55a   :  { %494 = vrot.lane.b32.xlu1 %v493_v43, %s2034_s5 }
 0x5cc   :  { %v495_v44 = vpop.permute.xlu1 %494 }
 0x5cd   :  { %1639 = vmatmul.mubr.msk.f32.vlgmr.msra.gmra.mrb[2].mxu1 %vm108_vm1, %v495_v44 }
 0x5ce   :  { %1741 = vmatpush3.bf16.msra.mxu1 %v2164_v9  ;;  %1660 = vmatprep.mubr.msk.f32.mxu1 %vm2030_vm0, %v2031_v1 }
 0x5cf   :  { %1742 = vmatprep.subr.bf16.mxu1 %v2029_v0 }
 0x5d2   :  { %1744 = vmatpush3.bf16.msra.mxu1 %v2171_v15 }
 0x5d3   :  { %1751 = vmatprep.subr.bf16.mxu1 %v2029_v0 }
 0x6a0   :  { %v564_v45 = vpop.f32.mrb[2].mxu1 }
 0x6a1   :  { %v565_v46 = vadd.f32 %v2194_v18, %v564_v45  ;;  %v1640_v47 = vpop.f32.mrb[3].mxu1 }
 0x6a3   :  { %v569_v48 = vrot.slane %v565_v46, 6  ;;  %v570_v49 = vrot.slane %v565_v46, 7 }
 0x6a5   :  { %589 = vrot.lane.b32.xlu1 %v570_v49, %s2032_s18  ;;  %587 = vrot.lane.b32.xlu0 %v569_v48, %s2032_s18  ;;  %v573_v50 = vadd.f32 %v569_v48, %v2204_v27  ;;  %v574_v51 = vadd.f32 %v570_v49, %v2202_v26 }
 0x6a7   :  { %v1525_v52 = vmul.f32 -1.442695, %v573_v50  ;;  %v1526_v53 = vmul.f32 -1.442695, %v574_v51 }
 0x6a9   :  { %1809 = vpow2.f32 %v1525_v52 }
 0x6aa   :  { %1811 = vpow2.f32 %v1526_v53 }
 0x6b3   :  { %v1810_v54 = vpop.eup %1809 }
 0x6b4   :  { %v1812_v56 = vpop.eup %1811  ;;  %v581_v57 = vadd.f32 1.0, %v1810_v54 }
 0x6b5   :  { %v582_v58 = vadd.f32 1.0, %v1812_v56 }
 0x6b6   :  { %1813 = vrcp.f32 %v581_v57 }
 0x6b7   :  { %1815 = vrcp.f32 %v582_v58 }
 0x6c0   :  { %v1814_v59 = vpop.eup %1813 }
 0x6c1   :  { %v1816_v60 = vpop.eup %1815  ;;  %v607_v14 = vsub.f32 1.0, %v1814_v59  ;;  %v623_v21 = vmul.f32 %v1814_v59, %v619_v16 }
 0x6c2   :  { %v608_v11 = vsub.f32 1.0, %v1816_v60  ;;  %v624_v17 = vmul.f32 %v1816_v60, %v620_v12 }
 0x717   :  { %v590_v62 = vpop.permute.xlu1 %589  ;;  %v588_v63 = vpop.permute.xlu0 %587 }
 0x718   :  { %v594_v2 = vmul.f32 %v1816_v60, %v590_v62  ;;  %v593_v3 = vmul.f32 %v1814_v59, %v588_v63 }
 0x71a   :  { %599 = vrot.lane.b32.xlu1 %v594_v2, %s2032_s18  ;;  %597 = vrot.lane.b32.xlu0 %v593_v3, %s2032_s18 }
 0x78c   :  { %v600_v4 = vpop.permute.xlu1 %599  ;;  %v598_v5 = vpop.permute.xlu0 %597 }
 0x78d   :  { %v604_v6 = vadd.f32 %v600_v4, %v2202_v26  ;;  %v603_v7 = vadd.f32 %v598_v5, %v2204_v27 }
 0x78f   :  { %1817 = vtanh.f32 %v604_v6 }
 0x790   :  { %1819 = vtanh.f32 %v603_v7 }
 0x799   :  { %v1818_v8 = vpop.eup %1817 }
 0x79a   :  { %v1820_v10 = vpop.eup %1819  ;;  %613 = vrot.lane.b32.xlu1 %v1818_v8, %s2034_s5 }
 0x79b   :  { %611 = vrot.lane.b32.xlu0 %v1820_v10, %s2034_s5 }
 0x80c   :  { %v614_v13 = vpop.permute.xlu1 %613 }
 0x80d   :  { %v618_v19 = vmul.f32 %v614_v13, %v608_v11  ;;  %v612_v20 = vpop.permute.xlu0 %611 }
 0x80e   :  { %v617_v22 = vmul.f32 %v612_v20, %v607_v14 }
 0x80f   :  { %v2269_v23 = vadd.f32 %v624_v17, %v618_v19 }
 0x810   :  { %v2271_v24 = vadd.f32 %v623_v21, %v617_v22 }
 0x811   :  { %v639_v25 = vrot.slane %v2269_v23, 1  ;;  %v767_v60 = vrot.slane %v2269_v23, 7 }
 0x812   :  { %v638_v28 = vrot.slane %v2271_v24, 2  ;;  %v766_v2 = vrot.slane %v2271_v24, 7 }
 0x814   :  { %v640_v29 = vsel %vm348_vm3, %v639_v25, %v638_v28 }
 0x815   :  { %641 = vrot.lane.b32.xlu0 %v640_v29, %s2034_s5 }
 0x887   :  { %v642_v30 = vpop.permute.xlu0 %641 }
 0x888   :  { %1650 = vmatmul.mubr.msk.f32.vlgmr.msra.gmra.mrb[4].mxu0 %vm108_vm1, %v642_v30 }
 0x889   :  { %1747 = vmatpush3.bf16.msra.mxu0 %v2164_v9  ;;  %1671 = vmatprep.mubr.msk.f32.mxu0 %vm2030_vm0, %v2031_v1 }
 0x88a   :  { %1748 = vmatprep.subr.bf16.mxu0 %v2029_v0 }
 0x88d   :  { %1750 = vmatpush3.bf16.msra.mxu0 %v2171_v15 }
 0x88e   :  { %1757 = vmatprep.subr.bf16.mxu0 %v2029_v0 }
 0x95b   :  { %v711_v31 = vpop.f32.mrb[4].mxu0 }
 0x95c   :  { %v712_v32 = vadd.f32 %v2194_v18, %v711_v31  ;;  %v1651_v33 = vpop.f32.mrb[5].mxu0 }
 0x95e   :  { %v716_v34 = vrot.slane %v712_v32, 5  ;;  %v717_v35 = vrot.slane %v712_v32, 6 }
 0x960   :  { %736 = vrot.lane.b32.xlu0 %v717_v35, %s2032_s18  ;;  %734 = vrot.lane.b32.xlu1 %v716_v34, %s2032_s18  ;;  %v720_v36 = vadd.f32 %v716_v34, %v2204_v27  ;;  %v721_v37 = vadd.f32 %v717_v35, %v2202_v26 }
 0x962   :  { %v1528_v38 = vmul.f32 -1.442695, %v720_v36  ;;  %v1529_v39 = vmul.f32 -1.442695, %v721_v37 }
 0x964   :  { %1821 = vpow2.f32 %v1528_v38 }
 0x965   :  { %1823 = vpow2.f32 %v1529_v39 }
 0x96e   :  { %v1822_v42 = vpop.eup %1821 }
 0x96f   :  { %v1824_v43 = vpop.eup %1823  ;;  %v728_v44 = vadd.f32 1.0, %v1822_v42 }
 0x970   :  { %v729_v45 = vadd.f32 1.0, %v1824_v43 }
 0x971   :  { %1825 = vrcp.f32 %v728_v44 }
 0x972   :  { %1827 = vrcp.f32 %v729_v45 }
 0x97b   :  { %v1826_v46 = vpop.eup %1825 }
 0x97c   :  { %v1828_v47 = vpop.eup %1827  ;;  %v754_v63 = vsub.f32 1.0, %v1826_v46  ;;  %v770_v6 = vmul.f32 %v1826_v46, %v766_v2 }
 0x97d   :  { %v755_v59 = vsub.f32 1.0, %v1828_v47  ;;  %v771_v3 = vmul.f32 %v1828_v47, %v767_v60 }
 0x9d2   :  { %v737_v48 = vpop.permute.xlu0 %736  ;;  %v735_v49 = vpop.permute.xlu1 %734 }
 0x9d3   :  { %v741_v50 = vmul.f32 %v1828_v47, %v737_v48  ;;  %v740_v51 = vmul.f32 %v1826_v46, %v735_v49 }
 0x9d5   :  { %746 = vrot.lane.b32.xlu0 %v741_v50, %s2032_s18  ;;  %744 = vrot.lane.b32.xlu1 %v740_v51, %s2032_s18 }
 0xa47   :  { %v747_v52 = vpop.permute.xlu0 %746  ;;  %v745_v53 = vpop.permute.xlu1 %744 }
 0xa48   :  { %v751_v54 = vadd.f32 %v747_v52, %v2202_v26  ;;  %v750_v56 = vadd.f32 %v745_v53, %v2204_v27 }
 0xa4a   :  { %1829 = vtanh.f32 %v751_v54 }
 0xa4b   :  { %1831 = vtanh.f32 %v750_v56 }
 0xa54   :  { %v1830_v57 = vpop.eup %1829 }
 0xa55   :  { %v1832_v58 = vpop.eup %1831  ;;  %760 = vrot.lane.b32.xlu0 %v1830_v57, %s2034_s5 }
 0xa56   :  { %758 = vrot.lane.b32.xlu1 %v1832_v58, %s2034_s5 }
 0xac7   :  { %v761_v62 = vpop.permute.xlu0 %760 }
 0xac8   :  { %v765_v4 = vmul.f32 %v761_v62, %v755_v59  ;;  %v759_v5 = vpop.permute.xlu1 %758 }
 0xac9   :  { %v764_v7 = vmul.f32 %v759_v5, %v754_v63 }
 0xaca   :  { %v2297_v8 = vadd.f32 %v771_v3, %v765_v4 }
 0xacb   :  { %v2299_v10 = vadd.f32 %v770_v6, %v764_v7 }
 0xacc   :  { %v786_v11 = vrot.slane %v2297_v8, 2  ;;  %v914_v49 = vrot.slane %v2297_v8, 7 }
 0xacd   :  { %v785_v12 = vrot.slane %v2299_v10, 3  ;;  %v913_v52 = vrot.slane %v2299_v10, 7 }
 0xacf   :  { %v787_v13 = vsel %vm348_vm3, %v786_v11, %v785_v12 }
 0xad0   :  { %788 = vrot.lane.b32.xlu1 %v787_v13, %s2034_s5 }
 0xb42   :  { %v789_v14 = vpop.permute.xlu1 %788 }
 0xb43   :  { %1661 = vmatmul.mubr.msk.f32.vlgmr.msra.gmra.mrb[4].mxu1 %vm108_vm1, %v789_v14 }
 0xb44   :  { %1753 = vmatpush3.bf16.msra.mxu1 %v2164_v9  ;;  %1682 = vmatprep.mubr.msk.f32.mxu1 %vm2030_vm0, %v2031_v1 }
 0xb45   :  { %1754 = vmatprep.subr.bf16.mxu1 %v2029_v0 }
 0xb48   :  { %1756 = vmatpush3.bf16.msra.mxu1 %v2171_v15 }
 0xc16   :  { %v858_v16 = vpop.f32.mrb[4].mxu1 }
 0xc17   :  { %v859_v17 = vadd.f32 %v2194_v18, %v858_v16  ;;  %v1662_v19 = vpop.f32.mrb[5].mxu1 }
 0xc19   :  { %v863_v20 = vrot.slane %v859_v17, 4  ;;  %v864_v21 = vrot.slane %v859_v17, 5 }
 0xc1b   :  { %883 = vrot.lane.b32.xlu1 %v864_v21, %s2032_s18  ;;  %881 = vrot.lane.b32.xlu0 %v863_v20, %s2032_s18  ;;  %v867_v22 = vadd.f32 %v863_v20, %v2204_v27  ;;  %v868_v25 = vadd.f32 %v864_v21, %v2202_v26 }
 0xc1d   :  { %v1531_v28 = vmul.f32 -1.442695, %v867_v22  ;;  %v1532_v29 = vmul.f32 -1.442695, %v868_v25 }
 0xc1f   :  { %1833 = vpow2.f32 %v1531_v28 }
 0xc20   :  { %1835 = vpow2.f32 %v1532_v29 }
 0xc29   :  { %v1834_v30 = vpop.eup %1833 }
 0xc2a   :  { %v1836_v31 = vpop.eup %1835  ;;  %v875_v32 = vadd.f32 1.0, %v1834_v30 }
 0xc2b   :  { %v876_v33 = vadd.f32 1.0, %v1836_v31 }
 0xc2c   :  { %1837 = vrcp.f32 %v875_v32 }
 0xc2d   :  { %1839 = vrcp.f32 %v876_v33 }
 0xc36   :  { %v1838_v34 = vpop.eup %1837 }
 0xc37   :  { %v1840_v35 = vpop.eup %1839  ;;  %v901_v51 = vsub.f32 1.0, %v1838_v34  ;;  %v917_v57 = vmul.f32 %v1838_v34, %v913_v52 }
 0xc38   :  { %v902_v48 = vsub.f32 1.0, %v1840_v35  ;;  %v918_v53 = vmul.f32 %v1840_v35, %v914_v49 }
 0xc8d   :  { %v884_v36 = vpop.permute.xlu1 %883  ;;  %v882_v37 = vpop.permute.xlu0 %881 }
 0xc8e   :  { %v888_v38 = vmul.f32 %v1840_v35, %v884_v36  ;;  %v887_v39 = vmul.f32 %v1838_v34, %v882_v37 }
 0xc90   :  { %893 = vrot.lane.b32.xlu1 %v888_v38, %s2032_s18  ;;  %891 = vrot.lane.b32.xlu0 %v887_v39, %s2032_s18 }
 0xd02   :  { %v894_v42 = vpop.permute.xlu1 %893  ;;  %v892_v43 = vpop.permute.xlu0 %891 }
 0xd03   :  { %v898_v44 = vadd.f32 %v894_v42, %v2202_v26  ;;  %v897_v45 = vadd.f32 %v892_v43, %v2204_v27 }
 0xd05   :  { %1841 = vtanh.f32 %v898_v44 }
 0xd06   :  { %1843 = vtanh.f32 %v897_v45 }
 0xd0f   :  { %v1842_v46 = vpop.eup %1841 }
 0xd10   :  { %v1844_v47 = vpop.eup %1843  ;;  %907 = vrot.lane.b32.xlu1 %v1842_v46, %s2034_s5 }
 0xd11   :  { %905 = vrot.lane.b32.xlu0 %v1844_v47, %s2034_s5 }
 0xd82   :  { %v908_v50 = vpop.permute.xlu1 %907 }
 0xd83   :  { %v912_v54 = vmul.f32 %v908_v50, %v902_v48  ;;  %v906_v56 = vpop.permute.xlu0 %905 }
 0xd84   :  { %v911_v58 = vmul.f32 %v906_v56, %v901_v51 }
 0xd85   :  { %v2324_v59 = vadd.f32 %v918_v53, %v912_v54 }
 0xd86   :  { %v2326_v60 = vadd.f32 %v917_v57, %v911_v58 }
 0xd87   :  { %v933_v62 = vrot.slane %v2324_v59, 3  ;;  %v1061_v35 = vrot.slane %v2324_v59, 7 }
 0xd88   :  { %v932_v63 = vrot.slane %v2326_v60, 4  ;;  %v1060_v38 = vrot.slane %v2326_v60, 7 }
 0xd8a   :  { %v934_v2 = vsel %vm348_vm3, %v933_v62, %v932_v63 }
 0xd8b   :  { %935 = vrot.lane.b32.xlu0 %v934_v2, %s2034_s5 }
 0xdfd   :  { %v936_v3 = vpop.permute.xlu0 %935 }
 0xdfe   :  { %1672 = vmatmul.mubr.msk.f32.vlgmr.msra.gmra.mrb[6].mxu0 %vm108_vm1, %v936_v3 }
 0xdff   :  { %1759 = vmatpush3.bf16.msra.mxu0 %v2164_v9  ;;  %1693 = vmatprep.mubr.msk.f32.mxu0 %vm2030_vm0, %v2031_v1 }
 0xe00   :  { %1760 = vmatprep.subr.bf16.mxu0 %v2029_v0 }
 0xe03   :  { %1762 = vmatpush3.bf16.msra.mxu0 %v2171_v15 }
 0xed1   :  { %v1005_v4 = vpop.f32.mrb[6].mxu0 }
 0xed2   :  { %v1006_v5 = vadd.f32 %v2194_v18, %v1005_v4  ;;  %v1673_v6 = vpop.f32.mrb[7].mxu0 }
 0xed4   :  { %v1010_v7 = vrot.slane %v1006_v5, 3  ;;  %v1011_v11 = vrot.slane %v1006_v5, 4 }
 0xed6   :  { %1030 = vrot.lane.b32.xlu0 %v1011_v11, %s2032_s18  ;;  %1028 = vrot.lane.b32.xlu1 %v1010_v7, %s2032_s18  ;;  %v1014_v12 = vadd.f32 %v1010_v7, %v2204_v27  ;;  %v1015_v9 = vadd.f32 %v1011_v11, %v2202_v26 }
 0xed8   :  { %v1534_v13 = vmul.f32 -1.442695, %v1014_v12  ;;  %v1535_v1 = vmul.f32 -1.442695, %v1015_v9 }
 0xeda   :  { %1845 = vpow2.f32 %v1534_v13 }
 0xedb   :  { %1847 = vpow2.f32 %v1535_v1 }
 0xee4   :  { %v1846_v0 = vpop.eup %1845 }
 0xee5   :  { %v1848_v15 = vpop.eup %1847  ;;  %v1022_v14 = vadd.f32 1.0, %v1846_v0 }
 0xee6   :  { %v1023_v16 = vadd.f32 1.0, %v1848_v15 }
 0xee7   :  { %1849 = vrcp.f32 %v1022_v14 }
 0xee8   :  { %1851 = vrcp.f32 %v1023_v16 }
 0xef1   :  { %v1850_v17 = vpop.eup %1849 }
 0xef2   :  { %v1852_v19 = vpop.eup %1851  ;;  %v1048_v37 = vsub.f32 1.0, %v1850_v17  ;;  %v1064_v44 = vmul.f32 %v1850_v17, %v1060_v38 }
 0xef3   :  { %v1049_v34 = vsub.f32 1.0, %v1852_v19  ;;  %v1065_v39 = vmul.f32 %v1852_v19, %v1061_v35 }
 0xf48   :  { %v1031_v20 = vpop.permute.xlu0 %1030  ;;  %v1029_v21 = vpop.permute.xlu1 %1028 }
 0xf49   :  { %v1035_v22 = vmul.f32 %v1852_v19, %v1031_v20  ;;  %v1034_v25 = vmul.f32 %v1850_v17, %v1029_v21 }
 0xf4b   :  { %1040 = vrot.lane.b32.xlu0 %v1035_v22, %s2032_s18  ;;  %1038 = vrot.lane.b32.xlu1 %v1034_v25, %s2032_s18 }
 0xfbd   :  { %v1041_v28 = vpop.permute.xlu0 %1040  ;;  %v1039_v29 = vpop.permute.xlu1 %1038 }
 0xfbe   :  { %v1045_v30 = vadd.f32 %v1041_v28, %v2202_v26  ;;  %v1044_v31 = vadd.f32 %v1039_v29, %v2204_v27 }
 0xfc0   :  { %1853 = vtanh.f32 %v1045_v30 }
 0xfc1   :  { %1855 = vtanh.f32 %v1044_v31 }
 0xfca   :  { %v1854_v32 = vpop.eup %1853 }
 0xfcb   :  { %v1856_v33 = vpop.eup %1855  ;;  %1054 = vrot.lane.b32.xlu0 %v1854_v32, %s2034_s5 }
 0xfcc   :  { %1052 = vrot.lane.b32.xlu1 %v1856_v33, %s2034_s5 }
0x103d   :  { %v1055_v36 = vpop.permute.xlu0 %1054 }
0x103e   :  { %v1059_v42 = vmul.f32 %v1055_v36, %v1049_v34  ;;  %v1053_v43 = vpop.permute.xlu1 %1052 }
0x103f   :  { %v1058_v45 = vmul.f32 %v1053_v43, %v1048_v37 }
0x1040   :  { %v2351_v46 = vadd.f32 %v1065_v39, %v1059_v42 }
0x1041   :  { %v2353_v47 = vadd.f32 %v1064_v44, %v1058_v45 }
0x1042   :  { %v1080_v48 = vrot.slane %v2351_v46, 4  ;;  %v1208_v21 = vrot.slane %v2351_v46, 7 }
0x1043   :  { %v1079_v49 = vrot.slane %v2353_v47, 5  ;;  %v1207_v28 = vrot.slane %v2353_v47, 7 }
0x1045   :  { %v1081_v50 = vsel %vm348_vm3, %v1080_v48, %v1079_v49 }
0x1046   :  { %1082 = vrot.lane.b32.xlu1 %v1081_v50, %s2034_s5 }
0x10b8   :  { %v1083_v51 = vpop.permute.xlu1 %1082 }
0x10b9   :  { %1683 = vmatmul.mubr.msk.f32.vlgmr.msra.gmra.mrb[6].mxu1 %vm108_vm1, %v1083_v51 }
0x118c   :  { %v1152_v52 = vpop.f32.mrb[6].mxu1 }
0x118d   :  { %v1153_v53 = vadd.f32 %v2194_v18, %v1152_v52  ;;  %v1684_v54 = vpop.f32.mrb[7].mxu1 }
0x118f   :  { %v1157_v56 = vrot.slane %v1153_v53, 2  ;;  %v1158_v57 = vrot.slane %v1153_v53, 3 }
0x1191   :  { %1177 = vrot.lane.b32.xlu1 %v1158_v57, %s2032_s18  ;;  %1175 = vrot.lane.b32.xlu0 %v1157_v56, %s2032_s18  ;;  %v1161_v58 = vadd.f32 %v1157_v56, %v2204_v27  ;;  %v1162_v62 = vadd.f32 %v1158_v57, %v2202_v26 }
0x1193   :  { %v1537_v63 = vmul.f32 -1.442695, %v1161_v58  ;;  %v1538_v2 = vmul.f32 -1.442695, %v1162_v62 }
0x1195   :  { %1857 = vpow2.f32 %v1537_v63 }
0x1196   :  { %1859 = vpow2.f32 %v1538_v2 }
0x119f   :  { %v1858_v3 = vpop.eup %1857 }
0x11a0   :  { %v1860_v4 = vpop.eup %1859  ;;  %v1169_v5 = vadd.f32 1.0, %v1858_v3 }
0x11a1   :  { %v1170_v6 = vadd.f32 1.0, %v1860_v4 }
0x11a2   :  { %1861 = vrcp.f32 %v1169_v5 }
0x11a3   :  { %1863 = vrcp.f32 %v1170_v6 }
0x11ac   :  { %v1862_v7 = vpop.eup %1861 }
0x11ad   :  { %v1864_v11 = vpop.eup %1863  ;;  %v1195_v25 = vsub.f32 1.0, %v1862_v7  ;;  %v1211_v32 = vmul.f32 %v1862_v7, %v1207_v28 }
0x11ae   :  { %v1196_v20 = vsub.f32 1.0, %v1864_v11  ;;  %v1212_v29 = vmul.f32 %v1864_v11, %v1208_v21 }
0x1203   :  { %v1178_v12 = vpop.permute.xlu1 %1177  ;;  %v1176_v9 = vpop.permute.xlu0 %1175 }
0x1204   :  { %v1182_v13 = vmul.f32 %v1864_v11, %v1178_v12  ;;  %v1181_v1 = vmul.f32 %v1862_v7, %v1176_v9 }
0x1206   :  { %1187 = vrot.lane.b32.xlu1 %v1182_v13, %s2032_s18  ;;  %1185 = vrot.lane.b32.xlu0 %v1181_v1, %s2032_s18 }
0x1278   :  { %v1188_v0 = vpop.permute.xlu1 %1187  ;;  %v1186_v15 = vpop.permute.xlu0 %1185 }
0x1279   :  { %v1192_v14 = vadd.f32 %v1188_v0, %v2202_v26  ;;  %v1191_v16 = vadd.f32 %v1186_v15, %v2204_v27 }
0x127b   :  { %1865 = vtanh.f32 %v1192_v14 }
0x127c   :  { %1867 = vtanh.f32 %v1191_v16 }
0x1285   :  { %v1866_v17 = vpop.eup %1865 }
0x1286   :  { %v1868_v19 = vpop.eup %1867  ;;  %1201 = vrot.lane.b32.xlu1 %v1866_v17, %s2034_s5 }
0x1287   :  { %1199 = vrot.lane.b32.xlu0 %v1868_v19, %s2034_s5 }
0x12f8   :  { %v1202_v22 = vpop.permute.xlu1 %1201 }
0x12f9   :  { %v1206_v30 = vmul.f32 %v1202_v22, %v1196_v20  ;;  %v1200_v31 = vpop.permute.xlu0 %1199 }
0x12fa   :  { %v1205_v33 = vmul.f32 %v1200_v31, %v1195_v25 }
0x12fb   :  { %v2373_v34 = vadd.f32 %v1212_v29, %v1206_v30 }
0x12fc   :  { %v2375_v35 = vadd.f32 %v1211_v32, %v1205_v33 }
0x12fd   :  { %v1227_v36 = vrot.slane %v2373_v34, 5 }
0x12fe   :  { %v1226_v37 = vrot.slane %v2375_v35, 6 }
0x1300   :  { %v1228_v38 = vsel %vm348_vm3, %v1227_v36, %v1226_v37 }
0x1301   :  { %1229 = vrot.lane.b32.xlu0 %v1228_v38, %s2034_s5 }
0x1373   :  { %v1230_v39 = vpop.permute.xlu0 %1229 }
0x1374   :  { %1694 = vmatmul.mubr.msk.f32.vlgmr.msra.gmra.mrb[8].mxu0 %vm108_vm1, %v1230_v39 }
0x1447   :  { %v1299_v42 = vpop.f32.mrb[8].mxu0 }
0x1448   :  { %v1300_v43 = vadd.f32 %v2194_v18, %v1299_v42  ;;  %v1695_v44 = vpop.f32.mrb[9].mxu0 }
0x144a   :  { %v1304_v45 = vrot.slane %v1300_v43, 1  ;;  %v1305_v48 = vrot.slane %v1300_v43, 2 }
0x144c   :  { %1324 = vrot.lane.b32.xlu0 %v1305_v48, %s2032_s18  ;;  %1322 = vrot.lane.b32.xlu1 %v1304_v45, %s2032_s18  ;;  %v1308_v49 = vadd.f32 %v1304_v45, %v2204_v27  ;;  %v1309_v50 = vadd.f32 %v1305_v48, %v2202_v26 }
0x144e   :  { %v1540_v51 = vmul.f32 -1.442695, %v1308_v49  ;;  %v1541_v52 = vmul.f32 -1.442695, %v1309_v50 }
0x1450   :  { %1869 = vpow2.f32 %v1540_v51 }
0x1451   :  { %1871 = vpow2.f32 %v1541_v52 }
0x145a   :  { %v1870_v53 = vpop.eup %1869 }
0x145b   :  { %v1872_v54 = vpop.eup %1871  ;;  %v1316_v56 = vadd.f32 1.0, %v1870_v53 }
0x145c   :  { %v1317_v57 = vadd.f32 1.0, %v1872_v54 }
0x145d   :  { %1873 = vrcp.f32 %v1316_v56 }
0x145e   :  { %1875 = vrcp.f32 %v1317_v57 }
0x1467   :  { %v1874_v18 = vpop.eup %1873 }
0x1468   :  { %v1876_v58 = vpop.eup %1875 }
0x14be   :  { %v1325_v62 = vpop.permute.xlu0 %1324  ;;  %v1323_v63 = vpop.permute.xlu1 %1322 }
0x14bf   :  { %v1329_v2 = vmul.f32 %v1876_v58, %v1325_v62  ;;  %v1328_v3 = vmul.f32 %v1874_v18, %v1323_v63 }
0x14c1   :  { %1334 = vrot.lane.b32.xlu0 %v1329_v2, %s2032_s18  ;;  %1332 = vrot.lane.b32.xlu1 %v1328_v3, %s2032_s18 }
0x1533   :  { %v1335_v4 = vpop.permute.xlu0 %1334  ;;  %v1333_v5 = vpop.permute.xlu1 %1332 }
0x1534   :  { %v1339_v6 = vadd.f32 %v1335_v4, %v2202_v26  ;;  %v1338_v7 = vadd.f32 %v1333_v5, %v2204_v27  ;;  %v1381_v26 = vld [vmem:[#allocation10] sm:$0xff]  ;;  %v1382_v27 = vld [vmem:[#allocation10 + $0x8] sm:$0xff] }
0x1536   :  { %1877 = vtanh.f32 %v1339_v6 }
0x1537   :  { %1879 = vtanh.f32 %v1338_v7 }
0x1540   :  { %v1878_v11 = vpop.eup %1877 }
0x1541   :  { %v1880_v12 = vpop.eup %1879  ;;  %1348 = vrot.lane.b32.xlu0 %v1878_v11, %s2034_s5 }
0x1542   :  { %1346 = vrot.lane.b32.xlu1 %v1880_v12, %s2034_s5 }
0x1545   :  { %483 = vrot.lane.b32.xlu0 %v2241_v40, %s2034_s5  ;;  %v1383_v40 = vld [vmem:[#allocation10 + $0x10] sm:$0xff] }
0x1546   :  { %338 = vrot.lane.b32.xlu1 %v2217_v61, %s2034_s5  ;;  %v1763_v61 = vpack.c.bf16 %v1382_v27, %v1381_v26 }
0x1548   :  { %1764 = vmatprep.subr.bf16.mxu1 %v1763_v61 }
0x1549   :  { %776 = vrot.lane.b32.xlu0 %v2299_v10, %s2034_s5  ;;  %1766 = vmatpush3.bf16.msra.mxu1 %v1763_v61 }
0x154a   :  { %629 = vrot.lane.b32.xlu1 %v2271_v24, %s2034_s5  ;;  %v1343_v24 = vsub.f32 1.0, %v1876_v58 }
0x154d   :  { %1070 = vrot.lane.b32.xlu0 %v2353_v47, %s2034_s5 }
0x154e   :  { %923 = vrot.lane.b32.xlu1 %v2326_v60, %s2034_s5  ;;  %v1342_v60 = vsub.f32 1.0, %v1874_v18 }
0x1551   :  { %485 = vrot.lane.b32.xlu0 %v2243_v41, %s2034_s5  ;;  %v1384_v41 = vld [vmem:[#allocation10 + $0x18] sm:$0xff] }
0x1552   :  { %1217 = vrot.lane.b32.xlu1 %v2375_v35, %s2034_s5 }
0x1555   :  { %778 = vrot.lane.b32.xlu0 %v2297_v8, %s2034_s5  ;;  %v1355_v8 = vrot.slane %v2373_v34, 7 }
0x1556   :  { %340 = vrot.lane.b32.xlu1 %v2214_v55, %s2034_s5  ;;  %v1767_v55 = vpack.c.bf16 %v1384_v41, %v1383_v40 }
0x1558   :  { %1768 = vmatprep.subr.bf16.mxu1 %v1767_v55 }
0x1559   :  { %1072 = vrot.lane.b32.xlu0 %v2351_v46, %s2034_s5  ;;  %1770 = vmatpush3.bf16.msra.mxu1 %v1767_v55 }
0x155a   :  { %631 = vrot.lane.b32.xlu1 %v2269_v23, %s2034_s5  ;;  %v1354_v23 = vrot.slane %v2375_v35, 7 }
0x155c   :  { %v1358_v9 = vmul.f32 %v1874_v18, %v1354_v23 }
0x155e   :  { %925 = vrot.lane.b32.xlu1 %v2324_v59, %s2034_s5  ;;  %v1359_v59 = vmul.f32 %v1876_v58, %v1355_v8 }
0x1562   :  { %1219 = vrot.lane.b32.xlu1 %v2373_v34, %s2034_s5 }
0x15b3   :  { %v1349_v10 = vpop.permute.xlu0 %1348 }
0x15b4   :  { %v1353_v46 = vmul.f32 %v1349_v10, %v1343_v24  ;;  %v1347_v47 = vpop.permute.xlu1 %1346 }
0x15b5   :  { %v1352_v13 = vmul.f32 %v1347_v47, %v1342_v60 }
0x15b6   :  { %v1361_v1 = vadd.f32 %v1359_v59, %v1353_v46 }
0x15b7   :  { %v1360_v0 = vadd.f32 %v1358_v9, %v1352_v13  ;;  %v484_v15 = vpop.permute.xlu0 %483 }
0x15b8   :  { %490 = vst.msk [vmem:[#allocation3] sm:$0x2] %vm489_vm4, %v484_v15  ;;  %v339_v14 = vpop.permute.xlu1 %338  ;;  %v1373_v16 = vrot.slane %v1361_v1, 7 }
0x15b9   :  { %345 = vst.msk [vmem:[#allocation3] sm:$0x1] %vm344_vm5, %v339_v14  ;;  %1364 = vrot.lane.b32.xlu0 %v1360_v0, %s2034_s5 }
0x15ba   :  { %1374 = vrot.lane.b32.xlu1 %v1373_v16, %s2034_s5 }
0x15bb   :  { %v777_v17 = vpop.permute.xlu0 %776 }
0x15bc   :  { %783 = vst.msk [vmem:[#allocation3] sm:$0x8] %vm782_vm6, %v777_v17  ;;  %v630_v19 = vpop.permute.xlu1 %629 }
0x15bd   :  { %636 = vst.msk [vmem:[#allocation3] sm:$0x4] %vm635_vm7, %v630_v19  ;;  %1366 = vrot.lane.b32.xlu0 %v1361_v1, %s2034_s5 }
0x15bf   :  { %v1071_v20 = vpop.permute.xlu0 %1070 }
0x15c0   :  { %1077 = vst.msk [vmem:[#allocation3] sm:$0x20] %vm1076_vm8, %v1071_v20  ;;  %v924_v21 = vpop.permute.xlu1 %923 }
0x15c1   :  { %930 = vst.msk [vmem:[#allocation3] sm:$0x10] %vm929_vm9, %v924_v21 }
0x15c3   :  { %v486_v22 = vpop.permute.xlu0 %485 }
0x15c4   :  { %491 = vst.msk [vmem:[#allocation3 + $0x8] sm:$0x2] %vm489_vm4, %v486_v22  ;;  %v1218_v25 = vpop.permute.xlu1 %1217 }
0x15c5   :  { %1224 = vst.msk [vmem:[#allocation3] sm:$0x40] %vm1223_vm10, %v1218_v25 }
0x15c7   :  { %v779_v28 = vpop.permute.xlu0 %778 }
0x15c8   :  { %784 = vst.msk [vmem:[#allocation3 + $0x8] sm:$0x8] %vm782_vm6, %v779_v28  ;;  %v341_v29 = vpop.permute.xlu1 %340 }
0x15c9   :  { %346 = vst.msk [vmem:[#allocation3 + $0x8] sm:$0x1] %vm344_vm5, %v341_v29 }
0x15cb   :  { %v1073_v30 = vpop.permute.xlu0 %1072 }
0x15cc   :  { %1078 = vst.msk [vmem:[#allocation3 + $0x8] sm:$0x20] %vm1076_vm8, %v1073_v30  ;;  %v632_v31 = vpop.permute.xlu1 %631 }
0x15cd   :  { %637 = vst.msk [vmem:[#allocation3 + $0x8] sm:$0x4] %vm635_vm7, %v632_v31 }
0x15d0   :  { %v926_v32 = vpop.permute.xlu1 %925 }
0x15d1   :  { %931 = vst.msk [vmem:[#allocation3 + $0x8] sm:$0x10] %vm929_vm9, %v926_v32 }
0x15d4   :  { %v1220_v33 = vpop.permute.xlu1 %1219 }
0x15d5   :  { %1225 = vst.msk [vmem:[#allocation3 + $0x8] sm:$0x40] %vm1223_vm10, %v1220_v33 }
0x162b   :  { %v1365_v34 = vpop.permute.xlu0 %1364 }
0x162c   :  { %1371 = vst.msk [vmem:[#allocation3] sm:$0x80] %vm1370_vm11, %v1365_v34  ;;  %1377 = vst.msk [vmem:[#allocation2 - $0x7] sm:$0x80] %vm1370_vm11, %v1365_v34  ;;  %v1375_v35 = vpop.permute.xlu1 %1374 }
0x162d   :  { %1479 = vst.msk [vmem:[#allocation13 - $0x7] sm:$0x80] %vm1370_vm11, %v1365_v34 }
0x162e   :  { %1378 = vst.msk [vmem:[#allocation2 + $0x1] sm:$0x1] %vm344_vm5, %v1375_v35  ;;  %1480 = vst.msk [vmem:[#allocation13 + $0x1] sm:$0x1] %vm344_vm5, %v1375_v35 }
0x162f   :  { %v1367_v36 = vpop.permute.xlu0 %1366 }
0x1630   :  { %1372 = vst.msk [vmem:[#allocation3 + $0x8] sm:$0x80] %vm1370_vm11, %v1367_v36 }
0x1633   :  { %v1379_v37 = vld [vmem:[#allocation3] sm:$0xff] }
0x1634   :  { %1704 = vmatprep.mubr.msk.f32.mxu1 %vm108_vm1, %v1379_v37 }
0x1637   :  { %v1380_v38 = vld [vmem:[#allocation3 + $0x8] sm:$0xff] }
0x1638   :  { %1705 = vmatmul.mubr.msk.f32.vlgmr.msra.gmra.mrb[8].mxu1 %vm108_vm1, %v1380_v38 }
0x1639   :  { %1980 = shalt.err (!%p1977_p8)
}
0x163a   :  { %s1981_s12 = scalar_lea.hbm %s2483_s9, 32 }
0x163b   :  { %p1982_p9 = scmp.ne.s32.totalorder %s2483_s9, %s1981_s12  ;;  %p1985_p10 = scmp.lt.u32.totalorder %s1981_s12, %s2483_s9 }
0x163d   :  { %p1987_p11 = pnand %p1985_p10, %p1982_p9 }
0x163f   :  { %1990 = shalt.err (!%p1987_p11)
}
0x1640   :  { %1502 = dma.vmem_to_hbm [thread:$0]  %s1500_s24, 32, %s2483_s9, [#allocation14]   ;;  %v1542_v39 = vld [vmem:[%s2481_s7] ss:$0 sm:$0xff]  ;;  %vm1473_vm12 = vcmask 244736  }
0x1641   :  { %s2036_s14 = smov [#allocation12]  }
0x1642   :  { %s1486_s4 = sshll.u32 %s2036_s14, 4  ;;  %s1487_s4 = int_to_ptr.vmem [resolvable:$true] %s1486_s4 }
0x1643   :  { %s1991_s15 = scalar_lea.vmem %s1487_s4, 256  ;;  %p1996_p13 = scmp.lt.s32.totalorder %s1487_s4, %s1487_s4 }
0x1644   :  { %p1992_p12 = scmp.ne.s32.totalorder %s1487_s4, %s1991_s15  ;;  %p1997_p0 = scmp.lt.s32.totalorder %s1991_s15, %s1991_s15 }
0x1646   :  { %p1998_p1 = por %p1997_p0, %p1996_p13 }
0x1648   :  { %p1999_p2 = pnand %p1998_p1, %p1992_p12 }
0x170b   :  { %v1706_v42 = vpop.f32.mrb[8].mxu1 }
0x170c   :  { %v1470_v43 = vadd.f32 %v1706_v42, %v1542_v39  ;;  %v1464_v44 = vpop.f32.mrb[9].mxu1 }
0x170d   :  { %v1465_v45 = vadd.f32 %v1542_v39, %v1464_v44 }
0x170e   :  { %1475 = vst.msk [vmem:[#allocation12 + $0x8] sm:$0xff] %vm1473_vm12, %v1470_v43 }
0x170f   :  { %1474 = vst.msk [vmem:[#allocation12] sm:$0xff] %vm1473_vm12, %v1465_v45 }
0x1710   :  { %2002 = shalt.err (!%p1999_p2)
}
0x1711   :  { %s2003_s7 = scalar_lea.hbm %s2482_s8, 256 }
0x1712   :  { %p2004_p3 = scmp.ne.s32.totalorder %s2482_s8, %s2003_s7  ;;  %p2007_p4 = scmp.lt.u32.totalorder %s2003_s7, %s2482_s8 }
0x1714   :  { %p2009_p5 = pnand %p2007_p4, %p2004_p3 }
0x1716   :  { %2012 = shalt.err (!%p2009_p5)
}
0x1717   :  { %1492 = dma.vmem_to_hbm [thread:$0]  %s1487_s4, 256, %s2482_s8, [#allocation6], %s2025_s21, %s2025_s21, %s2026_s22  }
0x1718   :  { %2019 = dma.done.wait [#allocation6], 256  }
0x1719   :  { %2020 = vsyncadd [#allocation6], 4294967040 }
0x171a   :  { %2021 = dma.done.wait [#allocation14], 32  }
0x171b   :  { %2022 = vsyncadd [#allocation14], 4294967264 }
0x171c   :  { %1509 = vsyncpa [#allocation5], 1 }
0x171d   :  { %1510 = vsyncpa [#allocation8], 1 }
0x171e   :  { %1511 = vsyncpa [#allocation11], 1 }
0x171f   :  { %1512 = vsyncpa [#allocation6], 1 }
0x1720   :  { %1513 = vsyncpa [#allocation14], 1 }

</bundles_post_ra>
